<compile_context>
chip_gen: v7x
topology: tpu7x:2x2x1
jax: 0.10.0
libtpu: 0.0.40
codegen_flags: <defaults>
</compile_context>

<pallas_src>
import math
import jax
import jax.numpy as jnp
from jax import lax
from jax.experimental import pallas as pl
from jax.experimental.pallas import tpu as pltpu

# ---------------- configuration (small, deterministic) ----------------
N_NODES = 16      # number of graph nodes
IN_CH   = 8       # in_channels
HID     = 32      # hidden_channels
OUT_CH  = 4       # out_channels
K_IN    = 1.0     # args.k_in   (curvature of manifold_in)
K_OUT   = 1.0     # args.k_out  (curvature of manifold_hidden / manifold_out)
POWER_K = 2       # args.power_k
GRAPH_WEIGHT = 0.5
LN_EPS  = 1e-5
BN_EPS  = 1e-5
NORM_SCALE = 1.0  # nn.Parameter(torch.ones(())) of TransConvLayer, baked as a constant

# Order in which pre-massaged parameters are handed to the fused kernel.
_PARAM_ORDER = (
    # TransConv stem (euclidean input: time column already folded into bias)
    'fc0_ws', 'fc0_b', 'pos_ws', 'pos_b', 'ln0_g', 'ln0_b',
    # TransConvLayer Q/K/V HypLinears (space block / time column / bias)
    'wq_ws', 'wq_wt', 'wq_b', 'wk_ws', 'wk_wt', 'wk_b', 'wv_ws', 'wv_wt', 'wv_b',
    # v_map mlp + second layernorm + output HypLinear
    'vmap_w', 'vmap_b', 'ln1_g', 'ln1_b', 'fc1_ws', 'fc1_wt', 'fc1_b',
    # Euclidean GCN branch (BatchNorm folded to scale/shift)
    'gfc0_w', 'gfc0_b', 'gbn0_sc', 'gbn0_sh',
    'gconv_w', 'gconv_b', 'gbn1_sc', 'gbn1_sh',
    # decoders (aggregate='add')
    'dt_ws', 'dt_wt', 'dt_b', 'dg_w', 'dg_b',
)


# ---------------- the single fused Pallas kernel ----------------
def _fused_kernel(*refs):
    x_ref, adj_ref = refs[0], refs[1]
    o_ref = refs[-1]
    w = dict(zip(_PARAM_ORDER, refs[2:-1]))

    f32 = jnp.float32
    k = float(K_OUT)
    sqrt_k = math.sqrt(k)
    ns = abs(float(NORM_SCALE))

    x = x_ref[...]                                            # (N, IN_CH)

    def sq_norm(s):                                           # row-wise ||s||^2 -> (N, 1)
        return jnp.sum(s * s, axis=-1, keepdims=True)

    def time_of(s):                                           # Lorentz time coordinate
        return jnp.sqrt(sq_norm(s) + k)

    def hyp_lin(s, t, ws_ref, wt_ref, b_ref):
        # HypLinear space output on a split (t, s) Lorentz point; time recomputed by caller.
        return (jnp.dot(s, ws_ref[...], preferred_element_type=f32)
                + t * wt_ref[...] + b_ref[...])

    def mid_ln_act(sa, ta, sb, tb, g_ref, b_ref):
        # Lorentz mid_point of two points -> HypLayerNorm (space) -> relu; time recomputed.
        t_ave = (ta + tb) * 0.5
        s_ave = (sa + sb) * 0.5
        neg_inner = t_ave * t_ave - sq_norm(s_ave)            # -<m, m>_L
        coef = sqrt_k * lax.rsqrt(jnp.maximum(jnp.abs(neg_inner), 1e-8))
        ms = coef * s_ave                                     # space part of mid point
        mu = jnp.mean(ms, axis=-1, keepdims=True)
        var = jnp.mean((ms - mu) ** 2, axis=-1, keepdims=True)
        ln = (ms - mu) * lax.rsqrt(var + LN_EPS) * g_ref[...] + b_ref[...]
        s_out = jnp.maximum(ln, 0.0)
        return s_out, time_of(s_out)

    # ---------- TransConv stem: fc0 / positional embedding (x_manifold='euc') ----------
    # time coord of a euclidean input is 1, so its weight column is folded into the bias,
    # and the curvature rescale sqrt(k_out/k_in) is folded into the weights (prepare_params).
    s_fc = jnp.dot(x, w['fc0_ws'][...], preferred_element_type=f32) + w['fc0_b'][...]
    s_pos = jnp.dot(x, w['pos_ws'][...], preferred_element_type=f32) + w['pos_b'][...]
    h_s, h_t = mid_ln_act(s_fc, time_of(s_fc), s_pos, time_of(s_pos),
                          w['ln0_g'], w['ln0_b'])
    # TODO(synk): HypDropout / F.dropout are identity here (eval mode); training RNG dropout not implemented.

    # ---------- TransConvLayer (1 head, linear_focused attention) ----------
    # Q/K/V kept as three in-register dots from the live h_s/h_t vregs (a 3*HID-lane
    # concatenated matmul would require sub-128-lane value slicing; no extra HBM traffic
    # is saved inside the fused kernel since h_s is already resident).
    s_q = hyp_lin(h_s, h_t, w['wq_ws'], w['wq_wt'], w['wq_b'])
    s_k = hyp_lin(h_s, h_t, w['wk_ws'], w['wk_wt'], w['wk_b'])
    s_v = hyp_lin(h_s, h_t, w['wv_ws'], w['wv_wt'], w['wv_b'])

    def phi(u):                                               # (relu + eps)/|norm_scale|, fp(., p=2)
        y = (jnp.maximum(u, 0.0) + 1e-6) / ns
        yp = y * y                                            # power_k == 2
        n1 = jnp.sqrt(sq_norm(y))
        inv_n2 = lax.rsqrt(sq_norm(yp))
        return (n1 * inv_n2) * yp

    phi_q = phi(s_q)
    phi_k = phi(s_k)
    # Reassociated linear-focused attention (identical sums to the torch einsum chain):
    #   S = phi_q @ phi_k^T  (native NT matmul, no transposes), num = S @ v, den = rowsum(S).
    s_mat = lax.dot_general(phi_q, phi_k, (((1,), (1,)), ((), ())),
                            preferred_element_type=f32)       # (N, N)
    num = jnp.dot(s_mat, s_v, preferred_element_type=f32)     # (N, HID)
    den = jnp.sum(s_mat, axis=-1, keepdims=True)              # (N, 1)
    attn = num * pl.reciprocal(den + 1e-6, approx=True)
    v_map = jnp.dot(s_v, w['vmap_w'][...], preferred_element_type=f32) + w['vmap_b'][...]
    a_s = attn + v_map
    # projx + mid_point of a single on-manifold point are exact identities here
    # (a_t is defined as sqrt(||a_s||^2 + k)), so no epilogue is needed.
    a_t = time_of(a_s)

    # ---------- residual mid_point + LN + relu, then fc1 (-> manifold_out) ----------
    z_s, z_t = mid_ln_act(a_s, a_t, h_s, h_t, w['ln1_g'], w['ln1_b'])
    s1 = hyp_lin(z_s, z_t, w['fc1_ws'], w['fc1_wt'], w['fc1_b'])
    t1 = time_of(s1)

    # ---------- Euclidean GCN branch (BatchNorm eval-folded to scale/shift) ----------
    g = jnp.dot(x, w['gfc0_w'][...], preferred_element_type=f32) + w['gfc0_b'][...]
    g = jnp.maximum(g * w['gbn0_sc'][...] + w['gbn0_sh'][...], 0.0)
    agg = jnp.dot(adj_ref[...], g, preferred_element_type=f32)
    y = jnp.dot(agg, w['gconv_w'][...], preferred_element_type=f32) + w['gconv_b'][...] + g
    x2 = jnp.maximum(y * w['gbn1_sc'][...] + w['gbn1_sh'][...], 0.0)

    # ---------- decode (aggregate='add') ----------
    y1 = (jnp.dot(s1, w['dt_ws'][...], preferred_element_type=f32)
          + t1 * w['dt_wt'][...] + w['dt_b'][...])
    y2 = jnp.dot(x2, w['dg_w'][...], preferred_element_type=f32) + w['dg_b'][...]
    o_ref[...] = (1.0 - GRAPH_WEIGHT) * y1 + GRAPH_WEIGHT * y2


def hypformer_forward(x, adj, params):
    """Single pallas_call for the whole HypFormer forward (all operands resident in VMEM)."""
    n = x.shape[0]
    args = [x, adj] + [params[name] for name in _PARAM_ORDER]
    vmem = pl.BlockSpec(memory_space=pltpu.MemorySpace.VMEM)
    return pl.pallas_call(
        _fused_kernel,
        out_shape=jax.ShapeDtypeStruct((n, OUT_CH), jnp.float32),
        in_specs=[vmem] * len(args),
        out_specs=vmem,
    )(*args)


# ---------------- plain-JAX glue (hoisted, runs once) ----------------
def build_gcn_adjacency(edge_index, n):
    # GraphConvLayer normalization: deg = degree(col); value = rsqrt(deg[col]) * rsqrt(deg[row]);
    # adj[col, row] = value (messages flow row -> col).  Scatter stays outside the kernel.
    row, col = edge_index[0], edge_index[1]
    deg = jnp.zeros((n,), jnp.float32).at[col].add(1.0)
    d_inv_sqrt = jnp.where(deg > 0, lax.rsqrt(jnp.maximum(deg, 1.0)), 0.0)
    val = d_inv_sqrt[col] * d_inv_sqrt[row]
    val = jnp.nan_to_num(val, nan=0.0, posinf=0.0, neginf=0.0)
    return jnp.zeros((n, n), jnp.float32).at[col, row].add(val)


def bn_eval_fold(gamma, beta, running_mean, running_var):
    scale = gamma / jnp.sqrt(running_var + BN_EPS)
    shift = beta - running_mean * scale
    return scale, shift


def init_params(key):
    """Raw torch-layout parameters (HypLinear weights are (out, in+1): col 0 = time)."""
    def xavier(k_, shape, gain=math.sqrt(2.0)):          # HypLinear init
        fan_out, fan_in = shape
        a = gain * math.sqrt(6.0 / (fan_in + fan_out))
        return jax.random.uniform(k_, shape, jnp.float32, -a, a)

    def torch_linear(k_, out_f, in_f):                   # nn.Linear default init
        kw, kb = jax.random.split(k_)
        a = 1.0 / math.sqrt(in_f)
        w_ = jax.random.uniform(kw, (out_f, in_f), jnp.float32, -a, a)
        b_ = jax.random.uniform(kb, (out_f,), jnp.float32, -a, a)
        return w_, b_

    ks = jax.random.split(key, 12)
    zeros_h = jnp.zeros((HID,), jnp.float32)
    ones_h = jnp.ones((HID,), jnp.float32)
    p = {}
    # TransConv
    p['fc0_w'] = xavier(ks[0], (HID, IN_CH + 1)); p['fc0_b'] = zeros_h
    p['pos_w'] = xavier(ks[1], (HID, IN_CH + 1)); p['pos_b'] = zeros_h
    p['ln0_g'] = ones_h; p['ln0_b'] = zeros_h
    p['wq'] = xavier(ks[2], (HID, HID + 1)); p['bq'] = zeros_h
    p['wk'] = xavier(ks[3], (HID, HID + 1)); p['bk'] = zeros_h
    p['wv'] = xavier(ks[4], (HID, HID + 1)); p['bv'] = zeros_h
    p['vmap_w'], p['vmap_b'] = torch_linear(ks[5], HID, HID)
    p['ln1_g'] = ones_h; p['ln1_b'] = zeros_h
    p['fc1_w'] = xavier(ks[6], (HID, HID + 1)); p['fc1_b'] = zeros_h
    # GraphConv (Euclidean GCN branch), BatchNorm at fresh running stats
    p['gfc0_w'], p['gfc0_b'] = torch_linear(ks[7], HID, IN_CH)
    p['gconv_w'], p['gconv_b'] = torch_linear(ks[8], HID, HID)
    p['gbn0'] = (ones_h, zeros_h, zeros_h, ones_h)       # gamma, beta, mean, var
    p['gbn1'] = (ones_h, zeros_h, zeros_h, ones_h)
    # decoders (aggregate='add')
    p['dt_w'], p['dt_b'] = torch_linear(ks[9], OUT_CH, HID + 1)
    p['dg_w'], p['dg_b'] = torch_linear(ks[10], OUT_CH, HID)
    return p


def prepare_params(p):
    """One-time weight massaging (transposes, time-column splits, BN folding, curvature
    rescale) so the per-call dispatch path contains nothing but the pallas_call."""
    scale_in = math.sqrt(K_OUT / K_IN)

    def split_hyplin(w_, b_, scale=1.0):
        ws = w_[:, 1:].T * scale                # (din, dout)  space block
        wt = w_[:, :1].T * scale                # (1, dout)    time column
        bb = b_.reshape(1, -1) * scale
        return ws, wt, bb

    q = {}
    # fc0 / positional embedding: euclidean input => time coord == 1, fold wt into bias.
    ws, wt, bb = split_hyplin(p['fc0_w'], p['fc0_b'], scale_in)
    q['fc0_ws'], q['fc0_b'] = ws, bb + wt
    ws, wt, bb = split_hyplin(p['pos_w'], p['pos_b'], scale_in)
    q['pos_ws'], q['pos_b'] = ws, bb + wt
    q['ln0_g'] = p['ln0_g'].reshape(1, -1); q['ln0_b'] = p['ln0_b'].reshape(1, -1)
    for wname, bname, dst in (('wq', 'bq', 'wq'), ('wk', 'bk', 'wk'), ('wv', 'bv', 'wv')):
        ws, wt, bb = split_hyplin(p[wname], p[bname])
        q[f'{dst}_ws'], q[f'{dst}_wt'], q[f'{dst}_b'] = ws, wt, bb
    q['vmap_w'] = p['vmap_w'].T; q['vmap_b'] = p['vmap_b'].reshape(1, -1)
    q['ln1_g'] = p['ln1_g'].reshape(1, -1); q['ln1_b'] = p['ln1_b'].reshape(1, -1)
    ws, wt, bb = split_hyplin(p['fc1_w'], p['fc1_b'], math.sqrt(K_OUT / K_OUT))
    q['fc1_ws'], q['fc1_wt'], q['fc1_b'] = ws, wt, bb
    # GCN branch
    q['gfc0_w'] = p['gfc0_w'].T; q['gfc0_b'] = p['gfc0_b'].reshape(1, -1)
    sc0, sh0 = bn_eval_fold(*p['gbn0'])
    q['gbn0_sc'], q['gbn0_sh'] = sc0.reshape(1, -1), sh0.reshape(1, -1)
    q['gconv_w'] = p['gconv_w'].T; q['gconv_b'] = p['gconv_b'].reshape(1, -1)
    sc1, sh1 = bn_eval_fold(*p['gbn1'])
    q['gbn1_sc'], q['gbn1_sh'] = sc1.reshape(1, -1), sh1.reshape(1, -1)
    # decoders (decode_trans acts on the concatenated [t1, s1] vector)
    ws, wt, bb = split_hyplin(p['dt_w'], p['dt_b'])
    q['dt_ws'], q['dt_wt'], q['dt_b'] = ws, wt, bb
    q['dg_w'] = p['dg_w'].T; q['dg_b'] = p['dg_b'].reshape(1, -1)

    missing = set(_PARAM_ORDER) - set(q)
    assert not missing, missing
    return {k_: jnp.asarray(v, jnp.float32) for k_, v in q.items()}


if __name__ == "__main__":
    key = jax.random.PRNGKey(0)
    k_x, k_p = jax.random.split(key)
    x = jax.random.normal(k_x, (N_NODES, IN_CH), dtype=jnp.float32)
    src = jnp.arange(N_NODES, dtype=jnp.int32)
    dst = jnp.roll(src, -1)
    edge_index = jnp.stack([jnp.concatenate([src, dst]),
                            jnp.concatenate([dst, src])], axis=0)   # bidirectional ring

    raw_params = init_params(k_p)
    params = prepare_params(raw_params)                # hoisted: runs once, not per forward
    adj = build_gcn_adjacency(edge_index, N_NODES)     # hoisted: scatter stays in plain JAX

    fwd = jax.jit(hypformer_forward)
    out = jax.block_until_ready(fwd(x, adj, params))
    assert out.shape == (N_NODES, OUT_CH), out.shape
    assert bool(jnp.all(jnp.isfinite(out)))
    print("KERNEL_OK")
</pallas_src>

<mosaic_0001>
module attributes {stable_mosaic.version = 11 : i64} {
  func.func @_fused_kernel(%arg0: memref<16x8xf32, #tpu.memory_space<vmem>>, %arg1: memref<16x16xf32, #tpu.memory_space<vmem>>, %arg2: memref<8x32xf32, #tpu.memory_space<vmem>>, %arg3: memref<1x32xf32, #tpu.memory_space<vmem>>, %arg4: memref<8x32xf32, #tpu.memory_space<vmem>>, %arg5: memref<1x32xf32, #tpu.memory_space<vmem>>, %arg6: memref<1x32xf32, #tpu.memory_space<vmem>>, %arg7: memref<1x32xf32, #tpu.memory_space<vmem>>, %arg8: memref<32x32xf32, #tpu.memory_space<vmem>>, %arg9: memref<1x32xf32, #tpu.memory_space<vmem>>, %arg10: memref<1x32xf32, #tpu.memory_space<vmem>>, %arg11: memref<32x32xf32, #tpu.memory_space<vmem>>, %arg12: memref<1x32xf32, #tpu.memory_space<vmem>>, %arg13: memref<1x32xf32, #tpu.memory_space<vmem>>, %arg14: memref<32x32xf32, #tpu.memory_space<vmem>>, %arg15: memref<1x32xf32, #tpu.memory_space<vmem>>, %arg16: memref<1x32xf32, #tpu.memory_space<vmem>>, %arg17: memref<32x32xf32, #tpu.memory_space<vmem>>, %arg18: memref<1x32xf32, #tpu.memory_space<vmem>>, %arg19: memref<1x32xf32, #tpu.memory_space<vmem>>, %arg20: memref<1x32xf32, #tpu.memory_space<vmem>>, %arg21: memref<32x32xf32, #tpu.memory_space<vmem>>, %arg22: memref<1x32xf32, #tpu.memory_space<vmem>>, %arg23: memref<1x32xf32, #tpu.memory_space<vmem>>, %arg24: memref<8x32xf32, #tpu.memory_space<vmem>>, %arg25: memref<1x32xf32, #tpu.memory_space<vmem>>, %arg26: memref<1x32xf32, #tpu.memory_space<vmem>>, %arg27: memref<1x32xf32, #tpu.memory_space<vmem>>, %arg28: memref<32x32xf32, #tpu.memory_space<vmem>>, %arg29: memref<1x32xf32, #tpu.memory_space<vmem>>, %arg30: memref<1x32xf32, #tpu.memory_space<vmem>>, %arg31: memref<1x32xf32, #tpu.memory_space<vmem>>, %arg32: memref<32x4xf32, #tpu.memory_space<vmem>>, %arg33: memref<1x4xf32, #tpu.memory_space<vmem>>, %arg34: memref<1x4xf32, #tpu.memory_space<vmem>>, %arg35: memref<32x4xf32, #tpu.memory_space<vmem>>, %arg36: memref<1x4xf32, #tpu.memory_space<vmem>>, %arg37: memref<16x4xf32, #tpu.memory_space<vmem>>) attributes {dimension_semantics = [], scalar_prefetch = 0 : i64, scratch_operands = 0 : i64, tpu.core_type = #tpu.core_type<tc>} {
    %c0 = arith.constant 0 : index
    %c0_0 = arith.constant 0 : index
    %0 = vector.load %arg0[%c0, %c0_0] : memref<16x8xf32, #tpu.memory_space<vmem>>, vector<16x8xf32>
    %c0_1 = arith.constant 0 : index
    %c0_2 = arith.constant 0 : index
    %1 = vector.load %arg2[%c0_1, %c0_2] : memref<8x32xf32, #tpu.memory_space<vmem>>, vector<8x32xf32>
    %cst = arith.constant dense<0.000000e+00> : vector<16x32xf32>
    %2 = tpu.matmul %0, %1, %cst {dimension_numbers = #tpu.dot_dimension_numbers<[1], [0], [0], [1], [0, 0, 1, 1], [], []>} : vector<16x8xf32>, vector<8x32xf32>, vector<16x32xf32> -> vector<16x32xf32>
    %c0_3 = arith.constant 0 : index
    %c0_4 = arith.constant 0 : index
    %3 = vector.load %arg3[%c0_3, %c0_4] : memref<1x32xf32, #tpu.memory_space<vmem>>, vector<1x32xf32>
    %4 = vector.broadcast %3 : vector<1x32xf32> to vector<16x32xf32>
    %5 = arith.addf %2, %4 : vector<16x32xf32>
    %c0_5 = arith.constant 0 : index
    %c0_6 = arith.constant 0 : index
    %6 = vector.load %arg4[%c0_5, %c0_6] : memref<8x32xf32, #tpu.memory_space<vmem>>, vector<8x32xf32>
    %cst_7 = arith.constant dense<0.000000e+00> : vector<16x32xf32>
    %7 = tpu.matmul %0, %6, %cst_7 {dimension_numbers = #tpu.dot_dimension_numbers<[1], [0], [0], [1], [0, 0, 1, 1], [], []>} : vector<16x8xf32>, vector<8x32xf32>, vector<16x32xf32> -> vector<16x32xf32>
    %c0_8 = arith.constant 0 : index
    %c0_9 = arith.constant 0 : index
    %8 = vector.load %arg5[%c0_8, %c0_9] : memref<1x32xf32, #tpu.memory_space<vmem>>, vector<1x32xf32>
    %9 = vector.broadcast %8 : vector<1x32xf32> to vector<16x32xf32>
    %10 = arith.addf %7, %9 : vector<16x32xf32>
    %11 = arith.mulf %5, %5 : vector<16x32xf32>
    %cst_10 = arith.constant dense<0.000000e+00> : vector<16xf32>
    %12 = vector.multi_reduction <add>, %11, %cst_10 [1] : vector<16x32xf32> to vector<16xf32>
    %13 = vector.shape_cast %12 : vector<16xf32> to vector<16x1xf32>
    %cst_11 = arith.constant 1.000000e+00 : f32
    %14 = vector.broadcast %cst_11 : f32 to vector<16x1xf32>
    %15 = arith.addf %13, %14 : vector<16x1xf32>
    %16 = math.sqrt %15 : vector<16x1xf32>
    %17 = arith.mulf %10, %10 : vector<16x32xf32>
    %cst_12 = arith.constant dense<0.000000e+00> : vector<16xf32>
    %18 = vector.multi_reduction <add>, %17, %cst_12 [1] : vector<16x32xf32> to vector<16xf32>
    %19 = vector.shape_cast %18 : vector<16xf32> to vector<16x1xf32>
    %cst_13 = arith.constant 1.000000e+00 : f32
    %20 = vector.broadcast %cst_13 : f32 to vector<16x1xf32>
    %21 = arith.addf %19, %20 : vector<16x1xf32>
    %22 = math.sqrt %21 : vector<16x1xf32>
    %23 = arith.addf %16, %22 : vector<16x1xf32>
    %cst_14 = arith.constant 5.000000e-01 : f32
    %24 = vector.broadcast %cst_14 : f32 to vector<16x1xf32>
    %25 = arith.mulf %23, %24 : vector<16x1xf32>
    %26 = arith.addf %5, %10 : vector<16x32xf32>
    %cst_15 = arith.constant 5.000000e-01 : f32
    %27 = vector.broadcast %cst_15 : f32 to vector<16x32xf32>
    %28 = arith.mulf %26, %27 : vector<16x32xf32>
    %29 = arith.mulf %25, %25 : vector<16x1xf32>
    %30 = arith.mulf %28, %28 : vector<16x32xf32>
    %cst_16 = arith.constant dense<0.000000e+00> : vector<16xf32>
    %31 = vector.multi_reduction <add>, %30, %cst_16 [1] : vector<16x32xf32> to vector<16xf32>
    %32 = vector.shape_cast %31 : vector<16xf32> to vector<16x1xf32>
    %33 = arith.subf %29, %32 : vector<16x1xf32>
    %34 = math.absf %33 : vector<16x1xf32>
    %cst_17 = arith.constant 9.99999993E-9 : f32
    %35 = vector.broadcast %cst_17 : f32 to vector<16x1xf32>
    %36 = arith.maximumf %34, %35 : vector<16x1xf32>
    %37 = math.rsqrt %36 : vector<16x1xf32>
    %cst_18 = arith.constant 1.000000e+00 : f32
    %38 = vector.broadcast %cst_18 : f32 to vector<16x1xf32>
    %39 = arith.mulf %38, %37 : vector<16x1xf32>
    %40 = vector.broadcast %39 : vector<16x1xf32> to vector<16x32xf32>
    %41 = arith.mulf %40, %28 : vector<16x32xf32>
    %cst_19 = arith.constant dense<0.000000e+00> : vector<16xf32>
    %42 = vector.multi_reduction <add>, %41, %cst_19 [1] : vector<16x32xf32> to vector<16xf32>
    %43 = vector.shape_cast %42 : vector<16xf32> to vector<16x1xf32>
    %cst_20 = arith.constant 3.200000e+01 : f32
    %44 = vector.broadcast %cst_20 : f32 to vector<16x1xf32>
    %45 = arith.divf %43, %44 : vector<16x1xf32>
    %46 = vector.broadcast %45 : vector<16x1xf32> to vector<16x32xf32>
    %47 = arith.subf %41, %46 : vector<16x32xf32>
    %48 = arith.mulf %47, %47 : vector<16x32xf32>
    %cst_21 = arith.constant dense<0.000000e+00> : vector<16xf32>
    %49 = vector.multi_reduction <add>, %48, %cst_21 [1] : vector<16x32xf32> to vector<16xf32>
    %50 = vector.shape_cast %49 : vector<16xf32> to vector<16x1xf32>
    %cst_22 = arith.constant 3.200000e+01 : f32
    %51 = vector.broadcast %cst_22 : f32 to vector<16x1xf32>
    %52 = arith.divf %50, %51 : vector<16x1xf32>
    %53 = vector.broadcast %45 : vector<16x1xf32> to vector<16x32xf32>
    %54 = arith.subf %41, %53 : vector<16x32xf32>
    %cst_23 = arith.constant 9.99999974E-6 : f32
    %55 = vector.broadcast %cst_23 : f32 to vector<16x1xf32>
    %56 = arith.addf %52, %55 : vector<16x1xf32>
    %57 = math.rsqrt %56 : vector<16x1xf32>
    %58 = vector.broadcast %57 : vector<16x1xf32> to vector<16x32xf32>
    %59 = arith.mulf %54, %58 : vector<16x32xf32>
    %c0_24 = arith.constant 0 : index
    %c0_25 = arith.constant 0 : index
    %60 = vector.load %arg6[%c0_24, %c0_25] : memref<1x32xf32, #tpu.memory_space<vmem>>, vector<1x32xf32>
    %61 = vector.broadcast %60 : vector<1x32xf32> to vector<16x32xf32>
    %62 = arith.mulf %59, %61 : vector<16x32xf32>
    %c0_26 = arith.constant 0 : index
    %c0_27 = arith.constant 0 : index
    %63 = vector.load %arg7[%c0_26, %c0_27] : memref<1x32xf32, #tpu.memory_space<vmem>>, vector<1x32xf32>
    %64 = vector.broadcast %63 : vector<1x32xf32> to vector<16x32xf32>
    %65 = arith.addf %62, %64 : vector<16x32xf32>
    %cst_28 = arith.constant 0.000000e+00 : f32
    %66 = vector.broadcast %cst_28 : f32 to vector<16x32xf32>
    %67 = arith.maximumf %65, %66 : vector<16x32xf32>
    %68 = arith.mulf %67, %67 : vector<16x32xf32>
    %cst_29 = arith.constant dense<0.000000e+00> : vector<16xf32>
    %69 = vector.multi_reduction <add>, %68, %cst_29 [1] : vector<16x32xf32> to vector<16xf32>
    %70 = vector.shape_cast %69 : vector<16xf32> to vector<16x1xf32>
    %cst_30 = arith.constant 1.000000e+00 : f32
    %71 = vector.broadcast %cst_30 : f32 to vector<16x1xf32>
    %72 = arith.addf %70, %71 : vector<16x1xf32>
    %73 = math.sqrt %72 : vector<16x1xf32>
    %c0_31 = arith.constant 0 : index
    %c0_32 = arith.constant 0 : index
    %74 = vector.load %arg8[%c0_31, %c0_32] : memref<32x32xf32, #tpu.memory_space<vmem>>, vector<32x32xf32>
    %cst_33 = arith.constant dense<0.000000e+00> : vector<16x32xf32>
    %75 = tpu.matmul %67, %74, %cst_33 {dimension_numbers = #tpu.dot_dimension_numbers<[1], [0], [0], [1], [0, 0, 1, 1], [], []>} : vector<16x32xf32>, vector<32x32xf32>, vector<16x32xf32> -> vector<16x32xf32>
    %c0_34 = arith.constant 0 : index
    %c0_35 = arith.constant 0 : index
    %76 = vector.load %arg9[%c0_34, %c0_35] : memref<1x32xf32, #tpu.memory_space<vmem>>, vector<1x32xf32>
    %77 = vector.broadcast %73 : vector<16x1xf32> to vector<16x32xf32>
    %78 = vector.broadcast %76 : vector<1x32xf32> to vector<16x32xf32>
    %79 = arith.mulf %77, %78 : vector<16x32xf32>
    %80 = arith.addf %75, %79 : vector<16x32xf32>
    %c0_36 = arith.constant 0 : index
    %c0_37 = arith.constant 0 : index
    %81 = vector.load %arg10[%c0_36, %c0_37] : memref<1x32xf32, #tpu.memory_space<vmem>>, vector<1x32xf32>
    %82 = vector.broadcast %81 : vector<1x32xf32> to vector<16x32xf32>
    %83 = arith.addf %80, %82 : vector<16x32xf32>
    %c0_38 = arith.constant 0 : index
    %c0_39 = arith.constant 0 : index
    %84 = vector.load %arg11[%c0_38, %c0_39] : memref<32x32xf32, #tpu.memory_space<vmem>>, vector<32x32xf32>
    %cst_40 = arith.constant dense<0.000000e+00> : vector<16x32xf32>
    %85 = tpu.matmul %67, %84, %cst_40 {dimension_numbers = #tpu.dot_dimension_numbers<[1], [0], [0], [1], [0, 0, 1, 1], [], []>} : vector<16x32xf32>, vector<32x32xf32>, vector<16x32xf32> -> vector<16x32xf32>
    %c0_41 = arith.constant 0 : index
    %c0_42 = arith.constant 0 : index
    %86 = vector.load %arg12[%c0_41, %c0_42] : memref<1x32xf32, #tpu.memory_space<vmem>>, vector<1x32xf32>
    %87 = vector.broadcast %73 : vector<16x1xf32> to vector<16x32xf32>
    %88 = vector.broadcast %86 : vector<1x32xf32> to vector<16x32xf32>
    %89 = arith.mulf %87, %88 : vector<16x32xf32>
    %90 = arith.addf %85, %89 : vector<16x32xf32>
    %c0_43 = arith.constant 0 : index
    %c0_44 = arith.constant 0 : index
    %91 = vector.load %arg13[%c0_43, %c0_44] : memref<1x32xf32, #tpu.memory_space<vmem>>, vector<1x32xf32>
    %92 = vector.broadcast %91 : vector<1x32xf32> to vector<16x32xf32>
    %93 = arith.addf %90, %92 : vector<16x32xf32>
    %c0_45 = arith.constant 0 : index
    %c0_46 = arith.constant 0 : index
    %94 = vector.load %arg14[%c0_45, %c0_46] : memref<32x32xf32, #tpu.memory_space<vmem>>, vector<32x32xf32>
    %cst_47 = arith.constant dense<0.000000e+00> : vector<16x32xf32>
    %95 = tpu.matmul %67, %94, %cst_47 {dimension_numbers = #tpu.dot_dimension_numbers<[1], [0], [0], [1], [0, 0, 1, 1], [], []>} : vector<16x32xf32>, vector<32x32xf32>, vector<16x32xf32> -> vector<16x32xf32>
    %c0_48 = arith.constant 0 : index
    %c0_49 = arith.constant 0 : index
    %96 = vector.load %arg15[%c0_48, %c0_49] : memref<1x32xf32, #tpu.memory_space<vmem>>, vector<1x32xf32>
    %97 = vector.broadcast %73 : vector<16x1xf32> to vector<16x32xf32>
    %98 = vector.broadcast %96 : vector<1x32xf32> to vector<16x32xf32>
    %99 = arith.mulf %97, %98 : vector<16x32xf32>
    %100 = arith.addf %95, %99 : vector<16x32xf32>
    %c0_50 = arith.constant 0 : index
    %c0_51 = arith.constant 0 : index
    %101 = vector.load %arg16[%c0_50, %c0_51] : memref<1x32xf32, #tpu.memory_space<vmem>>, vector<1x32xf32>
    %102 = vector.broadcast %101 : vector<1x32xf32> to vector<16x32xf32>
    %103 = arith.addf %100, %102 : vector<16x32xf32>
    %cst_52 = arith.constant 0.000000e+00 : f32
    %104 = vector.broadcast %cst_52 : f32 to vector<16x32xf32>
    %105 = arith.maximumf %83, %104 : vector<16x32xf32>
    %cst_53 = arith.constant 9.99999997E-7 : f32
    %106 = vector.broadcast %cst_53 : f32 to vector<16x32xf32>
    %107 = arith.addf %105, %106 : vector<16x32xf32>
    %cst_54 = arith.constant 1.000000e+00 : f32
    %108 = vector.broadcast %cst_54 : f32 to vector<16x32xf32>
    %109 = arith.divf %107, %108 : vector<16x32xf32>
    %110 = arith.mulf %109, %109 : vector<16x32xf32>
    %111 = arith.mulf %109, %109 : vector<16x32xf32>
    %cst_55 = arith.constant dense<0.000000e+00> : vector<16xf32>
    %112 = vector.multi_reduction <add>, %111, %cst_55 [1] : vector<16x32xf32> to vector<16xf32>
    %113 = vector.shape_cast %112 : vector<16xf32> to vector<16x1xf32>
    %114 = math.sqrt %113 : vector<16x1xf32>
    %115 = arith.mulf %110, %110 : vector<16x32xf32>
    %cst_56 = arith.constant dense<0.000000e+00> : vector<16xf32>
    %116 = vector.multi_reduction <add>, %115, %cst_56 [1] : vector<16x32xf32> to vector<16xf32>
    %117 = vector.shape_cast %116 : vector<16xf32> to vector<16x1xf32>
    %118 = math.rsqrt %117 : vector<16x1xf32>
    %119 = arith.mulf %114, %118 : vector<16x1xf32>
    %120 = vector.broadcast %119 : vector<16x1xf32> to vector<16x32xf32>
    %121 = arith.mulf %120, %110 : vector<16x32xf32>
    %cst_57 = arith.constant 0.000000e+00 : f32
    %122 = vector.broadcast %cst_57 : f32 to vector<16x32xf32>
    %123 = arith.maximumf %93, %122 : vector<16x32xf32>
    %cst_58 = arith.constant 9.99999997E-7 : f32
    %124 = vector.broadcast %cst_58 : f32 to vector<16x32xf32>
    %125 = arith.addf %123, %124 : vector<16x32xf32>
    %cst_59 = arith.constant 1.000000e+00 : f32
    %126 = vector.broadcast %cst_59 : f32 to vector<16x32xf32>
    %127 = arith.divf %125, %126 : vector<16x32xf32>
    %128 = arith.mulf %127, %127 : vector<16x32xf32>
    %129 = arith.mulf %127, %127 : vector<16x32xf32>
    %cst_60 = arith.constant dense<0.000000e+00> : vector<16xf32>
    %130 = vector.multi_reduction <add>, %129, %cst_60 [1] : vector<16x32xf32> to vector<16xf32>
    %131 = vector.shape_cast %130 : vector<16xf32> to vector<16x1xf32>
    %132 = math.sqrt %131 : vector<16x1xf32>
    %133 = arith.mulf %128, %128 : vector<16x32xf32>
    %cst_61 = arith.constant dense<0.000000e+00> : vector<16xf32>
    %134 = vector.multi_reduction <add>, %133, %cst_61 [1] : vector<16x32xf32> to vector<16xf32>
    %135 = vector.shape_cast %134 : vector<16xf32> to vector<16x1xf32>
    %136 = math.rsqrt %135 : vector<16x1xf32>
    %137 = arith.mulf %132, %136 : vector<16x1xf32>
    %138 = vector.broadcast %137 : vector<16x1xf32> to vector<16x32xf32>
    %139 = arith.mulf %138, %128 : vector<16x32xf32>
    %cst_62 = arith.constant dense<0.000000e+00> : vector<16x16xf32>
    %140 = tpu.matmul %121, %139, %cst_62 {dimension_numbers = #tpu.dot_dimension_numbers<[1], [1], [0], [0], [0, 0, 1, 0], [], []>} : vector<16x32xf32>, vector<16x32xf32>, vector<16x16xf32> -> vector<16x16xf32>
    %cst_63 = arith.constant dense<0.000000e+00> : vector<16x32xf32>
    %141 = tpu.matmul %140, %103, %cst_63 {dimension_numbers = #tpu.dot_dimension_numbers<[1], [0], [0], [1], [0, 0, 1, 1], [], []>} : vector<16x16xf32>, vector<16x32xf32>, vector<16x32xf32> -> vector<16x32xf32>
    %cst_64 = arith.constant dense<0.000000e+00> : vector<16xf32>
    %142 = vector.multi_reduction <add>, %140, %cst_64 [1] : vector<16x16xf32> to vector<16xf32>
    %143 = vector.shape_cast %142 : vector<16xf32> to vector<16x1xf32>
    %cst_65 = arith.constant 9.99999997E-7 : f32
    %144 = vector.broadcast %cst_65 : f32 to vector<16x1xf32>
    %145 = arith.addf %143, %144 : vector<16x1xf32>
    %146 = tpu.reciprocal %145 {approx = true} : vector<16x1xf32> -> vector<16x1xf32>
    %147 = vector.broadcast %146 : vector<16x1xf32> to vector<16x32xf32>
    %148 = arith.mulf %141, %147 : vector<16x32xf32>
    %c0_66 = arith.constant 0 : index
    %c0_67 = arith.constant 0 : index
    %149 = vector.load %arg17[%c0_66, %c0_67] : memref<32x32xf32, #tpu.memory_space<vmem>>, vector<32x32xf32>
    %cst_68 = arith.constant dense<0.000000e+00> : vector<16x32xf32>
    %150 = tpu.matmul %103, %149, %cst_68 {dimension_numbers = #tpu.dot_dimension_numbers<[1], [0], [0], [1], [0, 0, 1, 1], [], []>} : vector<16x32xf32>, vector<32x32xf32>, vector<16x32xf32> -> vector<16x32xf32>
    %c0_69 = arith.constant 0 : index
    %c0_70 = arith.constant 0 : index
    %151 = vector.load %arg18[%c0_69, %c0_70] : memref<1x32xf32, #tpu.memory_space<vmem>>, vector<1x32xf32>
    %152 = vector.broadcast %151 : vector<1x32xf32> to vector<16x32xf32>
    %153 = arith.addf %150, %152 : vector<16x32xf32>
    %154 = arith.addf %148, %153 : vector<16x32xf32>
    %155 = arith.mulf %154, %154 : vector<16x32xf32>
    %cst_71 = arith.constant dense<0.000000e+00> : vector<16xf32>
    %156 = vector.multi_reduction <add>, %155, %cst_71 [1] : vector<16x32xf32> to vector<16xf32>
    %157 = vector.shape_cast %156 : vector<16xf32> to vector<16x1xf32>
    %cst_72 = arith.constant 1.000000e+00 : f32
    %158 = vector.broadcast %cst_72 : f32 to vector<16x1xf32>
    %159 = arith.addf %157, %158 : vector<16x1xf32>
    %160 = math.sqrt %159 : vector<16x1xf32>
    %161 = arith.addf %160, %73 : vector<16x1xf32>
    %cst_73 = arith.constant 5.000000e-01 : f32
    %162 = vector.broadcast %cst_73 : f32 to vector<16x1xf32>
    %163 = arith.mulf %161, %162 : vector<16x1xf32>
    %164 = arith.addf %154, %67 : vector<16x32xf32>
    %cst_74 = arith.constant 5.000000e-01 : f32
    %165 = vector.broadcast %cst_74 : f32 to vector<16x32xf32>
    %166 = arith.mulf %164, %165 : vector<16x32xf32>
    %167 = arith.mulf %163, %163 : vector<16x1xf32>
    %168 = arith.mulf %166, %166 : vector<16x32xf32>
    %cst_75 = arith.constant dense<0.000000e+00> : vector<16xf32>
    %169 = vector.multi_reduction <add>, %168, %cst_75 [1] : vector<16x32xf32> to vector<16xf32>
    %170 = vector.shape_cast %169 : vector<16xf32> to vector<16x1xf32>
    %171 = arith.subf %167, %170 : vector<16x1xf32>
    %172 = math.absf %171 : vector<16x1xf32>
    %cst_76 = arith.constant 9.99999993E-9 : f32
    %173 = vector.broadcast %cst_76 : f32 to vector<16x1xf32>
    %174 = arith.maximumf %172, %173 : vector<16x1xf32>
    %175 = math.rsqrt %174 : vector<16x1xf32>
    %cst_77 = arith.constant 1.000000e+00 : f32
    %176 = vector.broadcast %cst_77 : f32 to vector<16x1xf32>
    %177 = arith.mulf %176, %175 : vector<16x1xf32>
    %178 = vector.broadcast %177 : vector<16x1xf32> to vector<16x32xf32>
    %179 = arith.mulf %178, %166 : vector<16x32xf32>
    %cst_78 = arith.constant dense<0.000000e+00> : vector<16xf32>
    %180 = vector.multi_reduction <add>, %179, %cst_78 [1] : vector<16x32xf32> to vector<16xf32>
    %181 = vector.shape_cast %180 : vector<16xf32> to vector<16x1xf32>
    %cst_79 = arith.constant 3.200000e+01 : f32
    %182 = vector.broadcast %cst_79 : f32 to vector<16x1xf32>
    %183 = arith.divf %181, %182 : vector<16x1xf32>
    %184 = vector.broadcast %183 : vector<16x1xf32> to vector<16x32xf32>
    %185 = arith.subf %179, %184 : vector<16x32xf32>
    %186 = arith.mulf %185, %185 : vector<16x32xf32>
    %cst_80 = arith.constant dense<0.000000e+00> : vector<16xf32>
    %187 = vector.multi_reduction <add>, %186, %cst_80 [1] : vector<16x32xf32> to vector<16xf32>
    %188 = vector.shape_cast %187 : vector<16xf32> to vector<16x1xf32>
    %cst_81 = arith.constant 3.200000e+01 : f32
    %189 = vector.broadcast %cst_81 : f32 to vector<16x1xf32>
    %190 = arith.divf %188, %189 : vector<16x1xf32>
    %191 = vector.broadcast %183 : vector<16x1xf32> to vector<16x32xf32>
    %192 = arith.subf %179, %191 : vector<16x32xf32>
    %cst_82 = arith.constant 9.99999974E-6 : f32
    %193 = vector.broadcast %cst_82 : f32 to vector<16x1xf32>
    %194 = arith.addf %190, %193 : vector<16x1xf32>
    %195 = math.rsqrt %194 : vector<16x1xf32>
    %196 = vector.broadcast %195 : vector<16x1xf32> to vector<16x32xf32>
    %197 = arith.mulf %192, %196 : vector<16x32xf32>
    %c0_83 = arith.constant 0 : index
    %c0_84 = arith.constant 0 : index
    %198 = vector.load %arg19[%c0_83, %c0_84] : memref<1x32xf32, #tpu.memory_space<vmem>>, vector<1x32xf32>
    %199 = vector.broadcast %198 : vector<1x32xf32> to vector<16x32xf32>
    %200 = arith.mulf %197, %199 : vector<16x32xf32>
    %c0_85 = arith.constant 0 : index
    %c0_86 = arith.constant 0 : index
    %201 = vector.load %arg20[%c0_85, %c0_86] : memref<1x32xf32, #tpu.memory_space<vmem>>, vector<1x32xf32>
    %202 = vector.broadcast %201 : vector<1x32xf32> to vector<16x32xf32>
    %203 = arith.addf %200, %202 : vector<16x32xf32>
    %cst_87 = arith.constant 0.000000e+00 : f32
    %204 = vector.broadcast %cst_87 : f32 to vector<16x32xf32>
    %205 = arith.maximumf %203, %204 : vector<16x32xf32>
    %206 = arith.mulf %205, %205 : vector<16x32xf32>
    %cst_88 = arith.constant dense<0.000000e+00> : vector<16xf32>
    %207 = vector.multi_reduction <add>, %206, %cst_88 [1] : vector<16x32xf32> to vector<16xf32>
    %208 = vector.shape_cast %207 : vector<16xf32> to vector<16x1xf32>
    %cst_89 = arith.constant 1.000000e+00 : f32
    %209 = vector.broadcast %cst_89 : f32 to vector<16x1xf32>
    %210 = arith.addf %208, %209 : vector<16x1xf32>
    %211 = math.sqrt %210 : vector<16x1xf32>
    %c0_90 = arith.constant 0 : index
    %c0_91 = arith.constant 0 : index
    %212 = vector.load %arg21[%c0_90, %c0_91] : memref<32x32xf32, #tpu.memory_space<vmem>>, vector<32x32xf32>
    %cst_92 = arith.constant dense<0.000000e+00> : vector<16x32xf32>
    %213 = tpu.matmul %205, %212, %cst_92 {dimension_numbers = #tpu.dot_dimension_numbers<[1], [0], [0], [1], [0, 0, 1, 1], [], []>} : vector<16x32xf32>, vector<32x32xf32>, vector<16x32xf32> -> vector<16x32xf32>
    %c0_93 = arith.constant 0 : index
    %c0_94 = arith.constant 0 : index
    %214 = vector.load %arg22[%c0_93, %c0_94] : memref<1x32xf32, #tpu.memory_space<vmem>>, vector<1x32xf32>
    %215 = vector.broadcast %211 : vector<16x1xf32> to vector<16x32xf32>
    %216 = vector.broadcast %214 : vector<1x32xf32> to vector<16x32xf32>
    %217 = arith.mulf %215, %216 : vector<16x32xf32>
    %218 = arith.addf %213, %217 : vector<16x32xf32>
    %c0_95 = arith.constant 0 : index
    %c0_96 = arith.constant 0 : index
    %219 = vector.load %arg23[%c0_95, %c0_96] : memref<1x32xf32, #tpu.memory_space<vmem>>, vector<1x32xf32>
    %220 = vector.broadcast %219 : vector<1x32xf32> to vector<16x32xf32>
    %221 = arith.addf %218, %220 : vector<16x32xf32>
    %222 = arith.mulf %221, %221 : vector<16x32xf32>
    %cst_97 = arith.constant dense<0.000000e+00> : vector<16xf32>
    %223 = vector.multi_reduction <add>, %222, %cst_97 [1] : vector<16x32xf32> to vector<16xf32>
    %224 = vector.shape_cast %223 : vector<16xf32> to vector<16x1xf32>
    %cst_98 = arith.constant 1.000000e+00 : f32
    %225 = vector.broadcast %cst_98 : f32 to vector<16x1xf32>
    %226 = arith.addf %224, %225 : vector<16x1xf32>
    %227 = math.sqrt %226 : vector<16x1xf32>
    %c0_99 = arith.constant 0 : index
    %c0_100 = arith.constant 0 : index
    %228 = vector.load %arg24[%c0_99, %c0_100] : memref<8x32xf32, #tpu.memory_space<vmem>>, vector<8x32xf32>
    %cst_101 = arith.constant dense<0.000000e+00> : vector<16x32xf32>
    %229 = tpu.matmul %0, %228, %cst_101 {dimension_numbers = #tpu.dot_dimension_numbers<[1], [0], [0], [1], [0, 0, 1, 1], [], []>} : vector<16x8xf32>, vector<8x32xf32>, vector<16x32xf32> -> vector<16x32xf32>
    %c0_102 = arith.constant 0 : index
    %c0_103 = arith.constant 0 : index
    %230 = vector.load %arg25[%c0_102, %c0_103] : memref<1x32xf32, #tpu.memory_space<vmem>>, vector<1x32xf32>
    %231 = vector.broadcast %230 : vector<1x32xf32> to vector<16x32xf32>
    %232 = arith.addf %229, %231 : vector<16x32xf32>
    %c0_104 = arith.constant 0 : index
    %c0_105 = arith.constant 0 : index
    %233 = vector.load %arg26[%c0_104, %c0_105] : memref<1x32xf32, #tpu.memory_space<vmem>>, vector<1x32xf32>
    %234 = vector.broadcast %233 : vector<1x32xf32> to vector<16x32xf32>
    %235 = arith.mulf %232, %234 : vector<16x32xf32>
    %c0_106 = arith.constant 0 : index
    %c0_107 = arith.constant 0 : index
    %236 = vector.load %arg27[%c0_106, %c0_107] : memref<1x32xf32, #tpu.memory_space<vmem>>, vector<1x32xf32>
    %237 = vector.broadcast %236 : vector<1x32xf32> to vector<16x32xf32>
    %238 = arith.addf %235, %237 : vector<16x32xf32>
    %cst_108 = arith.constant 0.000000e+00 : f32
    %239 = vector.broadcast %cst_108 : f32 to vector<16x32xf32>
    %240 = arith.maximumf %238, %239 : vector<16x32xf32>
    %c0_109 = arith.constant 0 : index
    %c0_110 = arith.constant 0 : index
    %241 = vector.load %arg1[%c0_109, %c0_110] : memref<16x16xf32, #tpu.memory_space<vmem>>, vector<16x16xf32>
    %cst_111 = arith.constant dense<0.000000e+00> : vector<16x32xf32>
    %242 = tpu.matmul %241, %240, %cst_111 {dimension_numbers = #tpu.dot_dimension_numbers<[1], [0], [0], [1], [0, 0, 1, 1], [], []>} : vector<16x16xf32>, vector<16x32xf32>, vector<16x32xf32> -> vector<16x32xf32>
    %c0_112 = arith.constant 0 : index
    %c0_113 = arith.constant 0 : index
    %243 = vector.load %arg28[%c0_112, %c0_113] : memref<32x32xf32, #tpu.memory_space<vmem>>, vector<32x32xf32>
    %cst_114 = arith.constant dense<0.000000e+00> : vector<16x32xf32>
    %244 = tpu.matmul %242, %243, %cst_114 {dimension_numbers = #tpu.dot_dimension_numbers<[1], [0], [0], [1], [0, 0, 1, 1], [], []>} : vector<16x32xf32>, vector<32x32xf32>, vector<16x32xf32> -> vector<16x32xf32>
    %c0_115 = arith.constant 0 : index
    %c0_116 = arith.constant 0 : index
    %245 = vector.load %arg29[%c0_115, %c0_116] : memref<1x32xf32, #tpu.memory_space<vmem>>, vector<1x32xf32>
    %246 = vector.broadcast %245 : vector<1x32xf32> to vector<16x32xf32>
    %247 = arith.addf %244, %246 : vector<16x32xf32>
    %248 = arith.addf %247, %240 : vector<16x32xf32>
    %c0_117 = arith.constant 0 : index
    %c0_118 = arith.constant 0 : index
    %249 = vector.load %arg30[%c0_117, %c0_118] : memref<1x32xf32, #tpu.memory_space<vmem>>, vector<1x32xf32>
    %250 = vector.broadcast %249 : vector<1x32xf32> to vector<16x32xf32>
    %251 = arith.mulf %248, %250 : vector<16x32xf32>
    %c0_119 = arith.constant 0 : index
    %c0_120 = arith.constant 0 : index
    %252 = vector.load %arg31[%c0_119, %c0_120] : memref<1x32xf32, #tpu.memory_space<vmem>>, vector<1x32xf32>
    %253 = vector.broadcast %252 : vector<1x32xf32> to vector<16x32xf32>
    %254 = arith.addf %251, %253 : vector<16x32xf32>
    %cst_121 = arith.constant 0.000000e+00 : f32
    %255 = vector.broadcast %cst_121 : f32 to vector<16x32xf32>
    %256 = arith.maximumf %254, %255 : vector<16x32xf32>
    %c0_122 = arith.constant 0 : index
    %c0_123 = arith.constant 0 : index
    %257 = vector.load %arg32[%c0_122, %c0_123] : memref<32x4xf32, #tpu.memory_space<vmem>>, vector<32x4xf32>
    %cst_124 = arith.constant dense<0.000000e+00> : vector<16x4xf32>
    %258 = tpu.matmul %221, %257, %cst_124 {dimension_numbers = #tpu.dot_dimension_numbers<[1], [0], [0], [1], [0, 0, 1, 1], [], []>} : vector<16x32xf32>, vector<32x4xf32>, vector<16x4xf32> -> vector<16x4xf32>
    %c0_125 = arith.constant 0 : index
    %c0_126 = arith.constant 0 : index
    %259 = vector.load %arg33[%c0_125, %c0_126] : memref<1x4xf32, #tpu.memory_space<vmem>>, vector<1x4xf32>
    %260 = vector.broadcast %227 : vector<16x1xf32> to vector<16x4xf32>
    %261 = vector.broadcast %259 : vector<1x4xf32> to vector<16x4xf32>
    %262 = arith.mulf %260, %261 : vector<16x4xf32>
    %263 = arith.addf %258, %262 : vector<16x4xf32>
    %c0_127 = arith.constant 0 : index
    %c0_128 = arith.constant 0 : index
    %264 = vector.load %arg34[%c0_127, %c0_128] : memref<1x4xf32, #tpu.memory_space<vmem>>, vector<1x4xf32>
    %265 = vector.broadcast %264 : vector<1x4xf32> to vector<16x4xf32>
    %266 = arith.addf %263, %265 : vector<16x4xf32>
    %c0_129 = arith.constant 0 : index
    %c0_130 = arith.constant 0 : index
    %267 = vector.load %arg35[%c0_129, %c0_130] : memref<32x4xf32, #tpu.memory_space<vmem>>, vector<32x4xf32>
    %cst_131 = arith.constant dense<0.000000e+00> : vector<16x4xf32>
    %268 = tpu.matmul %256, %267, %cst_131 {dimension_numbers = #tpu.dot_dimension_numbers<[1], [0], [0], [1], [0, 0, 1, 1], [], []>} : vector<16x32xf32>, vector<32x4xf32>, vector<16x4xf32> -> vector<16x4xf32>
    %c0_132 = arith.constant 0 : index
    %c0_133 = arith.constant 0 : index
    %269 = vector.load %arg36[%c0_132, %c0_133] : memref<1x4xf32, #tpu.memory_space<vmem>>, vector<1x4xf32>
    %270 = vector.broadcast %269 : vector<1x4xf32> to vector<16x4xf32>
    %271 = arith.addf %268, %270 : vector<16x4xf32>
    %cst_134 = arith.constant 5.000000e-01 : f32
    %272 = vector.broadcast %cst_134 : f32 to vector<16x4xf32>
    %273 = arith.mulf %272, %266 : vector<16x4xf32>
    %cst_135 = arith.constant 5.000000e-01 : f32
    %274 = vector.broadcast %cst_135 : f32 to vector<16x4xf32>
    %275 = arith.mulf %274, %271 : vector<16x4xf32>
    %276 = arith.addf %273, %275 : vector<16x4xf32>
    %c0_136 = arith.constant 0 : index
    %c0_137 = arith.constant 0 : index
    %277 = vector.load %arg37[%c0_136, %c0_137] : memref<16x4xf32, #tpu.memory_space<vmem>>, vector<16x4xf32>
    tpu.vector_store %arg37[%c0_136, %c0_137], %276 {strides = array<i32>} : memref<16x4xf32, #tpu.memory_space<vmem>>, vector<16x4xf32>,
    return
  }
}

</mosaic_0001>

<bundles_post_ra>
// kernel: hypformer_forward.1
= control target key start
LH: loop header
LB: loop body
LE: loop exit
PB: predicated region body
PF: predicated region fallthrough
CT: control target
= control target key end

     0   :  { %s2965_s6 = smov 1   ;;  %s2966_s10 = smov 2   ;;  %s3501_s0 = inlined_call_operand.smem [shape: u32[38], index: -1, kind: input, shape index: {}] }
   0x1   :  { %s3029_s5 = sld [smem:[%s3501_s0]]   ;;  %s2967_s14 = smov 3  }
   0x2   :  { %s3034_s9 = sld [smem:[%s3501_s0 + %s2965_s6]]   ;;  %s2968_s18 = smov 4  }
   0x3   :  { %s3039_s13 = sld [smem:[%s3501_s0 + %s2966_s10]]   ;;  %s2969_s22 = smov 5  }
   0x4   :  { %s3044_s17 = sld [smem:[%s3501_s0 + %s2967_s14]]   ;;  %s2970_s26 = smov 6  }
   0x5   :  { %s3049_s21 = sld [smem:[%s3501_s0 + %s2968_s18]]   ;;  %s2971_s30 = smov 7  }
   0x6   :  { %s3054_s25 = sld [smem:[%s3501_s0 + %s2969_s22]]   ;;  %s2972_s4 = smov 8  }
   0x7   :  { %3510 = sst [smem:[#allocation37_spill]] %s3029_s5  ;;  %s2973_s10 = smov 9  }
   0x8   :  { %s3059_s29 = sld [smem:[%s3501_s0 + %s2970_s26]]   ;;  %s2974_s15 = smov 10  }
   0x9   :  { %s3064_s3 = sld [smem:[%s3501_s0 + %s2971_s30]]   ;;  %s2975_s20 = smov 11  }
   0xa   :  { %s3069_s8 = sld [smem:[%s3501_s0 + %s2972_s4]]   ;;  %s2976_s26 = smov 12  }
   0xb   :  { %3511 = sst [smem:[#allocation38_spill]] %s3049_s21  ;;  %s2977_s1 = smov 13  }
   0xc   :  { %3512 = sst [smem:[#allocation39_spill]] %s3054_s25  ;;  %s2978_s7 = smov 14  }
   0xd   :  { %s3074_s14 = sld [smem:[%s3501_s0 + %s2973_s10]]   ;;  %s2980_s22 = smov 16  }
   0xe   :  { %3513 = sst [smem:[#allocation40_spill]] %s3059_s29  ;;  %s2981_s28 = smov 17  }
   0xf   :  { %3514 = sst [smem:[#allocation41_spill]] %s3064_s3 }
  0x10   :  { %3515 = sst [smem:[#allocation42_spill]] %s3069_s8 }
  0x11   :  { %s3079_s19 = sld [smem:[%s3501_s0 + %s2974_s15]]   ;;  %s2979_s15 = smov 15  }
  0x12   :  { %s3084_s24 = sld [smem:[%s3501_s0 + %s2975_s20]]  }
  0x13   :  { %3516 = sst [smem:[#allocation43_spill]] %s3074_s14 }
  0x14   :  { %s3089_s30 = sld [smem:[%s3501_s0 + %s2976_s26]]  }
  0x15   :  { %s3094_s6 = sld [smem:[%s3501_s0 + %s2977_s1]]  }
  0x16   :  { %s3099_s12 = sld [smem:[%s3501_s0 + %s2978_s7]]   ;;  %s2982_s7 = smov 18  }
  0x17   :  { %3517 = sst [smem:[#allocation44_spill]] %s3079_s19 }
  0x18   :  { %3518 = sst [smem:[#allocation45_spill]] %s3084_s24 }
  0x19   :  { %s3104_s20 = sld [smem:[%s3501_s0 + %s2979_s15]]   ;;  %s2983_s15 = smov 19  }
  0x1a   :  { %3519 = sst [smem:[#allocation46_spill]] %s3089_s30 }
  0x1b   :  { %3520 = sst [smem:[#allocation47_spill]] %s3094_s6 }
  0x1c   :  { %3521 = sst [smem:[#allocation48_spill]] %s3099_s12 }
  0x1d   :  { %s3109_s27 = sld [smem:[%s3501_s0 + %s2980_s22]]   ;;  %s2984_s22 = smov 20  }
  0x1e   :  { %s3114_s4 = sld [smem:[%s3501_s0 + %s2981_s28]]   ;;  %s2985_s28 = smov 21  }
  0x1f   :  { %3522 = sst [smem:[#allocation49_spill]] %s3104_s20 }
  0x20   :  { %s3119_s6 = sld [smem:[%s3501_s0 + %s2982_s7]]   ;;  %s2986_s7 = smov 22  }
  0x21   :  { %s3124_s20 = sld [smem:[%s3501_s0 + %s2983_s15]]   ;;  %s2987_s15 = smov 23  }
  0x23   :  { %3523 = sst [smem:[#allocation50_spill]] %s3109_s27 }
  0x24   :  { %3524 = sst [smem:[#allocation51_spill]] %s3114_s4 }
  0x25   :  { %s3129_s27 = sld [smem:[%s3501_s0 + %s2984_s22]]   ;;  %s2988_s22 = smov 24  }
  0x26   :  { %3525 = sst [smem:[#allocation52_spill]] %s3119_s6 }
  0x27   :  { %3526 = sst [smem:[#allocation53_spill]] %s3124_s20 }
  0x28   :  { %s3134_s4 = sld [smem:[%s3501_s0 + %s2985_s28]]   ;;  %s2989_s28 = smov 25  }
  0x29   :  { %s3139_s6 = sld [smem:[%s3501_s0 + %s2986_s7]]   ;;  %s2990_s7 = smov 26  }
  0x2a   :  { %s3144_s20 = sld [smem:[%s3501_s0 + %s2987_s15]]   ;;  %s2991_s15 = smov 27  }
  0x2b   :  { %s3149_s19 = sld [smem:[%s3501_s0 + %s2988_s22]]   ;;  %s2992_s22 = smov 28  }
  0x2c   :  { %s3154_s30 = sld [smem:[%s3501_s0 + %s2989_s28]]   ;;  %s2993_s28 = smov 29  }
  0x2d   :  { %s3159_s14 = sld [smem:[%s3501_s0 + %s2990_s7]]   ;;  %s2994_s7 = smov 30  }
  0x2e   :  { %s3164_s3 = sld [smem:[%s3501_s0 + %s2991_s15]]   ;;  %s2995_s15 = smov 31  }
  0x2f   :  { %s3169_s29 = sld [smem:[%s3501_s0 + %s2992_s22]]   ;;  %s2996_s22 = smov 32  }
  0x30   :  { %s3174_s12 = sld [smem:[%s3501_s0 + %s2993_s28]]   ;;  %s2997_s28 = smov 33  }
  0x31   :  { %s3179_s24 = sld [smem:[%s3501_s0 + %s2994_s7]]   ;;  %s2998_s7 = smov 34  }
  0x32   :  { %s3184_s8 = sld [smem:[%s3501_s0 + %s2995_s15]]   ;;  %s2999_s15 = smov 35  }
  0x33   :  { %s3194_s25 = sld [smem:[%s3501_s0 + %s2997_s28]]   ;;  %s3001_s28 = smov 37  }
  0x34   :  { %s3199_s5 = sld [smem:[%s3501_s0 + %s2998_s7]]  }
  0x35   :  { %3527 = sst [smem:[#allocation54_spill]] %s3169_s29 }
  0x36   :  { %s3189_s29 = sld [smem:[%s3501_s0 + %s2996_s22]]   ;;  %s3000_s22 = smov 36  }
  0x37   :  { %s3204_s21 = sld [smem:[%s3501_s0 + %s2999_s15]]  }
  0x39   :  { %3529 = sst [smem:[#allocation56_spill]] %s3194_s25 }
  0x3a   :  { %s3214_s25 = sld [smem:[%s3501_s0 + %s3001_s28]]  }
  0x3c   :  { %3528 = sst [smem:[#allocation55_spill]] %s3189_s29 }
  0x3d   :  { %s3209_s29 = sld [smem:[%s3501_s0 + %s3000_s22]]  }
  0x3e   :  { %80 = vsyncpa [#allocation3], 0 }
  0x3f   :  { %81 = vsyncpa [#allocation5], 0 }
  0x40   :  { %82 = vsyncpa [#allocation8], 0 }
  0x41   :  { %83 = vsyncpa [#allocation11], 0 }
  0x42   :  { %84 = vsyncpa [#allocation14], 0 }
  0x43   :  { %85 = vsyncpa [#allocation17], 0 }
  0x44   :  { %86 = vsyncpa [#allocation20], 0 }
  0x45   :  { %87 = vsyncpa [#allocation23], 0 }
  0x46   :  { %88 = vsyncpa [#allocation26], 0  ;;  %s3002_s7 = smov [#allocation4]   ;;  %s3003_s11 = smov [#allocation7]  }
  0x47   :  { %s109_s10 = sshll.u32 %s3002_s7, 4  ;;  %s161_s15 = sshll.u32 %s3003_s11, 4  ;;  %s110_s10 = int_to_ptr.vmem [resolvable:$true] %s109_s10  ;;  %s162_s15 = int_to_ptr.vmem [resolvable:$true] %s161_s15 }
  0x48   :  { %s2573_s0 = scalar_lea.hbm %s3039_s13, 128 }
  0x49   :  { %p2574_p0 = scmp.ne.s32.totalorder %s3039_s13, %s2573_s0  ;;  %p2577_p1 = scmp.lt.u32.totalorder %s2573_s0, %s3039_s13 }
  0x4b   :  { %p2579_p2 = pnand %p2577_p1, %p2574_p0 }
  0x4d   :  { %2582 = shalt.err (!%p2579_p2)
}
  0x4e   :  { %s2583_s16 = scalar_lea.vmem %s110_s10, 128  ;;  %p2588_p4 = scmp.lt.s32.totalorder %s110_s10, %s110_s10 }
  0x4f   :  { %p2584_p3 = scmp.ne.s32.totalorder %s110_s10, %s2583_s16  ;;  %p2589_p5 = scmp.lt.s32.totalorder %s2583_s16, %s2583_s16 }
  0x51   :  { %p2590_p6 = por %p2589_p5, %p2588_p4 }
  0x53   :  { %p2591_p7 = pnand %p2590_p6, %p2584_p3 }
  0x55   :  { %2594 = shalt.err (!%p2591_p7)
}
  0x56   :  { %112 = dma.hbm_to_vmem [thread:$0]  %s3039_s13, 128, %s110_s10, [#allocation5]  }
  0x57   :  { %s2595_s18 = scalar_lea.hbm %s3129_s27, 16 }
  0x58   :  { %p2596_p8 = scmp.ne.s32.totalorder %s3129_s27, %s2595_s18  ;;  %p2599_p9 = scmp.lt.u32.totalorder %s2595_s18, %s3129_s27 }
  0x5a   :  { %p2601_p10 = pnand %p2599_p9, %p2596_p8 }
  0x5c   :  { %2604 = shalt.err (!%p2601_p10)
}
  0x5d   :  { %s2605_s22 = scalar_lea.vmem %s162_s15, 16  ;;  %s2609_s23 = scalar_lea.vmem %s162_s15, 32 }
  0x5e   :  { %p2606_p11 = scmp.ne.s32.totalorder %s162_s15, %s2605_s22  ;;  %p2610_p12 = scmp.lt.s32.totalorder %s162_s15, %s162_s15 }
  0x5f   :  { %p2611_p13 = scmp.lt.s32.totalorder %s2609_s23, %s2605_s22 }
  0x61   :  { %p2612_p0 = por %p2611_p13, %p2610_p12 }
  0x63   :  { %p2613_p1 = pnand %p2612_p0, %p2606_p11 }
  0x65   :  { %2616 = shalt.err (!%p2613_p1)
}
  0x66   :  { %164 = dma.hbm_to_vmem [thread:$0]  %s3129_s27, 16, %s162_s15, [#allocation8]  }
  0x67   :  { %s3004_s26 = smov [#allocation10]   ;;  %s3005_s28 = smov [#allocation13]  }
  0x68   :  { %s183_s13 = sshll.u32 %s3004_s26, 4  ;;  %s203_s1 = sshll.u32 %s3005_s28, 4  ;;  %s184_s13 = int_to_ptr.vmem [resolvable:$true] %s183_s13  ;;  %s204_s1 = int_to_ptr.vmem [resolvable:$true] %s203_s1 }
  0x69   :  { %s2617_s2 = scalar_lea.hbm %s3139_s6, 16 }
  0x6a   :  { %p2618_p2 = scmp.ne.s32.totalorder %s3139_s6, %s2617_s2  ;;  %p2621_p3 = scmp.lt.u32.totalorder %s2617_s2, %s3139_s6 }
  0x6c   :  { %p2623_p4 = pnand %p2621_p3, %p2618_p2 }
  0x6e   :  { %2626 = shalt.err (!%p2623_p4)
}
  0x6f   :  { %s2627_s7 = scalar_lea.vmem %s184_s13, 16  ;;  %s2631_s10 = scalar_lea.vmem %s184_s13, 32 }
  0x70   :  { %p2628_p5 = scmp.ne.s32.totalorder %s184_s13, %s2627_s7  ;;  %p2632_p6 = scmp.lt.s32.totalorder %s184_s13, %s184_s13 }
  0x71   :  { %p2633_p7 = scmp.lt.s32.totalorder %s2631_s10, %s2627_s7 }
  0x73   :  { %p2634_p8 = por %p2633_p7, %p2632_p6 }
  0x75   :  { %p2635_p9 = pnand %p2634_p8, %p2628_p5 }
  0x77   :  { %2638 = shalt.err (!%p2635_p9)
}
  0x78   :  { %186 = dma.hbm_to_vmem [thread:$0]  %s3139_s6, 16, %s184_s13, [#allocation11]  }
  0x79   :  { %s2639_s27 = scalar_lea.hbm %s3149_s19, 128 }
  0x7a   :  { %p2640_p10 = scmp.ne.s32.totalorder %s3149_s19, %s2639_s27  ;;  %p2643_p11 = scmp.lt.u32.totalorder %s2639_s27, %s3149_s19 }
  0x7c   :  { %p2645_p12 = pnand %p2643_p11, %p2640_p10 }
  0x7e   :  { %2648 = shalt.err (!%p2645_p12)
}
  0x7f   :  { %s2649_s11 = scalar_lea.vmem %s204_s1, 128  ;;  %p2654_p0 = scmp.lt.s32.totalorder %s204_s1, %s204_s1 }
  0x80   :  { %p2650_p13 = scmp.ne.s32.totalorder %s204_s1, %s2649_s11  ;;  %p2655_p1 = scmp.lt.s32.totalorder %s2649_s11, %s2649_s11 }
  0x82   :  { %p2656_p2 = por %p2655_p1, %p2654_p0 }
  0x84   :  { %p2657_p3 = pnand %p2656_p2, %p2650_p13 }
  0x86   :  { %2660 = shalt.err (!%p2657_p3)
}
  0x87   :  { %206 = dma.hbm_to_vmem [thread:$0]  %s3149_s19, 128, %s204_s1, [#allocation14]  }
  0x88   :  { %s3006_s15 = smov [#allocation16]   ;;  %s3007_s6 = smov [#allocation19]  }
  0x89   :  { %s223_s0 = sshll.u32 %s3006_s15, 4  ;;  %s245_s16 = sshll.u32 %s3007_s6, 4  ;;  %s224_s0 = int_to_ptr.vmem [resolvable:$true] %s223_s0  ;;  %s246_s16 = int_to_ptr.vmem [resolvable:$true] %s245_s16 }
  0x8a   :  { %s2661_s18 = scalar_lea.hbm %s3159_s14, 16 }
  0x8b   :  { %p2662_p4 = scmp.ne.s32.totalorder %s3159_s14, %s2661_s18  ;;  %p2665_p5 = scmp.lt.u32.totalorder %s2661_s18, %s3159_s14 }
  0x8d   :  { %p2667_p6 = pnand %p2665_p5, %p2662_p4 }
  0x8f   :  { %2670 = shalt.err (!%p2667_p6)
}
  0x90   :  { %s2671_s22 = scalar_lea.vmem %s224_s0, 16  ;;  %s2675_s23 = scalar_lea.vmem %s224_s0, 32 }
  0x91   :  { %p2672_p7 = scmp.ne.s32.totalorder %s224_s0, %s2671_s22  ;;  %p2676_p8 = scmp.lt.s32.totalorder %s224_s0, %s224_s0 }
  0x92   :  { %p2677_p9 = scmp.lt.s32.totalorder %s2675_s23, %s2671_s22 }
  0x94   :  { %p2678_p10 = por %p2677_p9, %p2676_p8 }
  0x96   :  { %p2679_p11 = pnand %p2678_p10, %p2672_p7 }
  0x98   :  { %2682 = shalt.err (!%p2679_p11)
}
  0x99   :  { %226 = dma.hbm_to_vmem [thread:$0]  %s3159_s14, 16, %s224_s0, [#allocation17]  }
  0x9a   :  { %s2683_s19 = scalar_lea.hbm %s3174_s12, 16 }
  0x9b   :  { %p2684_p12 = scmp.ne.s32.totalorder %s3174_s12, %s2683_s19  ;;  %p2687_p13 = scmp.lt.u32.totalorder %s2683_s19, %s3174_s12 }
  0x9d   :  { %p2689_p0 = pnand %p2687_p13, %p2684_p12 }
  0x9f   :  { %2692 = shalt.err (!%p2689_p0)
}
  0xa0   :  { %s2693_s26 = scalar_lea.vmem %s246_s16, 16  ;;  %s2697_s13 = scalar_lea.vmem %s246_s16, 32 }
  0xa1   :  { %p2694_p1 = scmp.ne.s32.totalorder %s246_s16, %s2693_s26  ;;  %p2698_p2 = scmp.lt.s32.totalorder %s246_s16, %s246_s16 }
  0xa2   :  { %p2699_p3 = scmp.lt.s32.totalorder %s2697_s13, %s2693_s26 }
  0xa4   :  { %p2700_p4 = por %p2699_p3, %p2698_p2 }
  0xa6   :  { %p2701_p5 = pnand %p2700_p4, %p2694_p1 }
  0xa8   :  { %2704 = shalt.err (!%p2701_p5)
}
  0xa9   :  { %248 = dma.hbm_to_vmem [thread:$0]  %s3174_s12, 16, %s246_s16, [#allocation20]  }
  0xaa   :  { %s3008_s28 = smov [#allocation22]   ;;  %s3009_s1 = smov [#allocation25]  }
  0xab   :  { %s265_s14 = sshll.u32 %s3008_s28, 4  ;;  %s287_s2 = sshll.u32 %s3009_s1, 4  ;;  %s266_s14 = int_to_ptr.vmem [resolvable:$true] %s265_s14  ;;  %s288_s2 = int_to_ptr.vmem [resolvable:$true] %s287_s2 }
  0xac   :  { %s2705_s7 = scalar_lea.hbm %s3184_s8, 16 }
  0xad   :  { %p2706_p6 = scmp.ne.s32.totalorder %s3184_s8, %s2705_s7  ;;  %p2709_p7 = scmp.lt.u32.totalorder %s2705_s7, %s3184_s8 }
  0xaf   :  { %p2711_p8 = pnand %p2709_p7, %p2706_p6 }
  0xb1   :  { %2714 = shalt.err (!%p2711_p8)
}
  0xb2   :  { %s2715_s10 = scalar_lea.vmem %s266_s14, 16  ;;  %s2719_s27 = scalar_lea.vmem %s266_s14, 32 }
  0xb3   :  { %p2716_p9 = scmp.ne.s32.totalorder %s266_s14, %s2715_s10  ;;  %p2720_p10 = scmp.lt.s32.totalorder %s266_s14, %s266_s14 }
  0xb4   :  { %p2721_p11 = scmp.lt.s32.totalorder %s2719_s27, %s2715_s10 }
  0xb6   :  { %p2722_p12 = por %p2721_p11, %p2720_p10 }
  0xb8   :  { %p2723_p13 = pnand %p2722_p12, %p2716_p9 }
  0xba   :  { %2726 = shalt.err (!%p2723_p13)
}
  0xbb   :  { %268 = dma.hbm_to_vmem [thread:$0]  %s3184_s8, 16, %s266_s14, [#allocation23]  }
  0xbc   :  { %s2727_s12 = scalar_lea.hbm %s3199_s5, 16 }
  0xbd   :  { %p2728_p0 = scmp.ne.s32.totalorder %s3199_s5, %s2727_s12  ;;  %p2731_p1 = scmp.lt.u32.totalorder %s2727_s12, %s3199_s5 }
  0xbf   :  { %p2733_p2 = pnand %p2731_p1, %p2728_p0 }
  0xc1   :  { %2736 = shalt.err (!%p2733_p2)
}
  0xc2   :  { %s2737_s11 = scalar_lea.vmem %s288_s2, 16  ;;  %s2741_s15 = scalar_lea.vmem %s288_s2, 32 }
  0xc3   :  { %p2738_p3 = scmp.ne.s32.totalorder %s288_s2, %s2737_s11  ;;  %p2742_p4 = scmp.lt.s32.totalorder %s288_s2, %s288_s2 }
  0xc4   :  { %p2743_p5 = scmp.lt.s32.totalorder %s2741_s15, %s2737_s11 }
  0xc6   :  { %p2744_p6 = por %p2743_p5, %p2742_p4 }
  0xc8   :  { %p2745_p7 = pnand %p2744_p6, %p2738_p3 }
  0xca   :  { %2748 = shalt.err (!%p2745_p7)
}
  0xcb   :  { %290 = dma.hbm_to_vmem [thread:$0]  %s3199_s5, 16, %s288_s2, [#allocation26]  }
  0xcc   :  { %s3010_s0 = smov [#allocation2]   ;;  %s2749_s6 = scalar_lea.hbm %s3034_s9, 256 }
  0xcd   :  { %s96_s8 = sshll.u32 %s3010_s0, 4  ;;  %p2750_p8 = scmp.ne.s32.totalorder %s3034_s9, %s2749_s6  ;;  %s97_s8 = int_to_ptr.vmem [resolvable:$true] %s96_s8 }
  0xce   :  { %p2753_p9 = scmp.lt.u32.totalorder %s2749_s6, %s3034_s9 }
  0xd0   :  { %p2755_p10 = pnand %p2753_p9, %p2750_p8 }
  0xd2   :  { %2758 = shalt.err (!%p2755_p10)
}
  0xd3   :  { %s2759_s16 = scalar_lea.vmem %s97_s8, 256  ;;  %p2764_p12 = scmp.lt.s32.totalorder %s97_s8, %s97_s8 }
  0xd4   :  { %p2760_p11 = scmp.ne.s32.totalorder %s97_s8, %s2759_s16  ;;  %p2765_p13 = scmp.lt.s32.totalorder %s2759_s16, %s2759_s16 }
  0xd6   :  { %p2766_p0 = por %p2765_p13, %p2764_p12 }
  0xd8   :  { %p2767_p1 = pnand %p2766_p0, %p2760_p11 }
  0xda   :  { %2770 = shalt.err (!%p2767_p1)
}
  0xdb   :  { %s3011_s18 = smov 128   ;;  %s3012_s5 = smov 8  }
  0xdc   :  { %102 = dma.hbm_to_vmem [thread:$0]  %s3034_s9, 256, %s97_s8, [#allocation3], %s3011_s18, %s3011_s18, %s3012_s5  }
  0xdd   :  { %s3013_s22 = smov [#allocation6]   ;;  %s3014_s19 = smov [#allocation9]  }
  0xde   :  { %s119_s23 = sshll.u32 %s3013_s22, 4  ;;  %s170_s26 = sshll.u32 %s3014_s19, 4  ;;  %s120_s23 = int_to_ptr.vmem [resolvable:$true] %s119_s23  ;;  %s171_s26 = int_to_ptr.vmem [resolvable:$true] %s170_s26 }
  0xdf   :  { %s2771_s13 = scalar_lea.hbm %s3044_s17, 16 }
  0xe0   :  { %p2772_p2 = scmp.ne.s32.totalorder %s3044_s17, %s2771_s13  ;;  %p2775_p3 = scmp.lt.u32.totalorder %s2771_s13, %s3044_s17 }
  0xe2   :  { %p2777_p4 = pnand %p2775_p3, %p2772_p2 }
  0xe4   :  { %2780 = shalt.err (!%p2777_p4)
}
  0xe5   :  { %s2781_s28 = scalar_lea.vmem %s120_s23, 16  ;;  %s2785_s14 = scalar_lea.vmem %s120_s23, 32 }
  0xe6   :  { %p2782_p5 = scmp.ne.s32.totalorder %s120_s23, %s2781_s28  ;;  %p2786_p6 = scmp.lt.s32.totalorder %s120_s23, %s120_s23 }
  0xe7   :  { %p2787_p7 = scmp.lt.s32.totalorder %s2785_s14, %s2781_s28 }
  0xe9   :  { %p2788_p8 = por %p2787_p7, %p2786_p6 }
  0xeb   :  { %p2789_p9 = pnand %p2788_p8, %p2782_p5 }
  0xed   :  { %2792 = shalt.err (!%p2789_p9)
}
  0xee   :  { %122 = dma.hbm_to_vmem [thread:$0]  %s3044_s17, 16, %s120_s23, [#allocation5]  }
  0xef   :  { %s2793_s9 = scalar_lea.hbm %s3134_s4, 512 }
  0xf0   :  { %p2794_p10 = scmp.ne.s32.totalorder %s3134_s4, %s2793_s9  ;;  %p2797_p11 = scmp.lt.u32.totalorder %s2793_s9, %s3134_s4 }
  0xf2   :  { %p2799_p12 = pnand %p2797_p11, %p2794_p10 }
  0xf4   :  { %2802 = shalt.err (!%p2799_p12)
}
  0xf5   :  { %s2803_s1 = scalar_lea.vmem %s171_s26, 512  ;;  %p2808_p0 = scmp.lt.s32.totalorder %s171_s26, %s171_s26 }
  0xf6   :  { %p2804_p13 = scmp.ne.s32.totalorder %s171_s26, %s2803_s1  ;;  %p2809_p1 = scmp.lt.s32.totalorder %s2803_s1, %s2803_s1 }
  0xf8   :  { %p2810_p2 = por %p2809_p1, %p2808_p0 }
  0xfa   :  { %p2811_p3 = pnand %p2810_p2, %p2804_p13 }
  0xfc   :  { %2814 = shalt.err (!%p2811_p3)
}
  0xfd   :  { %176 = dma.hbm_to_vmem [thread:$0]  %s3134_s4, 512, %s171_s26, [#allocation8], %s3011_s18, %s3011_s18, %s3012_s5  }
  0xfe   :  { %s3015_s17 = smov [#allocation12]   ;;  %s3016_s7 = smov [#allocation15]  }
  0xff   :  { %s193_s2 = sshll.u32 %s3015_s17, 4  ;;  %s213_s10 = sshll.u32 %s3016_s7, 4  ;;  %s194_s2 = int_to_ptr.vmem [resolvable:$true] %s193_s2  ;;  %s214_s10 = int_to_ptr.vmem [resolvable:$true] %s213_s10 }
 0x100   :  { %s2815_s27 = scalar_lea.hbm %s3144_s20, 16 }
 0x101   :  { %p2816_p4 = scmp.ne.s32.totalorder %s3144_s20, %s2815_s27  ;;  %p2819_p5 = scmp.lt.u32.totalorder %s2815_s27, %s3144_s20 }
 0x103   :  { %p2821_p6 = pnand %p2819_p5, %p2816_p4 }
 0x105   :  { %2824 = shalt.err (!%p2821_p6)
}
 0x106   :  { %s2825_s12 = scalar_lea.vmem %s194_s2, 16  ;;  %s2829_s11 = scalar_lea.vmem %s194_s2, 32 }
 0x107   :  { %p2826_p7 = scmp.ne.s32.totalorder %s194_s2, %s2825_s12  ;;  %p2830_p8 = scmp.lt.s32.totalorder %s194_s2, %s194_s2 }
 0x108   :  { %p2831_p9 = scmp.lt.s32.totalorder %s2829_s11, %s2825_s12 }
 0x10a   :  { %p2832_p10 = por %p2831_p9, %p2830_p8 }
 0x10c   :  { %p2833_p11 = pnand %p2832_p10, %p2826_p7 }
 0x10e   :  { %2836 = shalt.err (!%p2833_p11)
}
 0x10f   :  { %196 = dma.hbm_to_vmem [thread:$0]  %s3144_s20, 16, %s194_s2, [#allocation11]  }
 0x110   :  { %s2837_s4 = scalar_lea.hbm %s3154_s30, 16 }
 0x111   :  { %p2838_p12 = scmp.ne.s32.totalorder %s3154_s30, %s2837_s4  ;;  %p2841_p13 = scmp.lt.u32.totalorder %s2837_s4, %s3154_s30 }
 0x113   :  { %p2843_p0 = pnand %p2841_p13, %p2838_p12 }
 0x115   :  { %2846 = shalt.err (!%p2843_p0)
}
 0x116   :  { %s2847_s15 = scalar_lea.vmem %s214_s10, 16  ;;  %s2851_s0 = scalar_lea.vmem %s214_s10, 32 }
 0x117   :  { %p2848_p1 = scmp.ne.s32.totalorder %s214_s10, %s2847_s15  ;;  %p2852_p2 = scmp.lt.s32.totalorder %s214_s10, %s214_s10 }
 0x118   :  { %p2853_p3 = scmp.lt.s32.totalorder %s2851_s0, %s2847_s15 }
 0x11a   :  { %p2854_p4 = por %p2853_p3, %p2852_p2 }
 0x11c   :  { %p2855_p5 = pnand %p2854_p4, %p2848_p1 }
 0x11e   :  { %2858 = shalt.err (!%p2855_p5)
}
 0x11f   :  { %216 = dma.hbm_to_vmem [thread:$0]  %s3154_s30, 16, %s214_s10, [#allocation14]  }
 0x120   :  { %s3017_s20 = smov [#allocation18]   ;;  %s3018_s6 = smov [#allocation21]  }
 0x121   :  { %s233_s8 = sshll.u32 %s3017_s20, 4  ;;  %s255_s16 = sshll.u32 %s3018_s6, 4  ;;  %s234_s8 = int_to_ptr.vmem [resolvable:$true] %s233_s8  ;;  %s256_s16 = int_to_ptr.vmem [resolvable:$true] %s255_s16 }
 0x122   :  { %s2859_s18 = scalar_lea.hbm %s3164_s3, 16 }
 0x123   :  { %p2860_p6 = scmp.ne.s32.totalorder %s3164_s3, %s2859_s18  ;;  %p2863_p7 = scmp.lt.u32.totalorder %s2859_s18, %s3164_s3 }
 0x125   :  { %p2865_p8 = pnand %p2863_p7, %p2860_p6 }
 0x127   :  { %2868 = shalt.err (!%p2865_p8)
}
 0x128   :  { %s2869_s5 = scalar_lea.vmem %s234_s8, 16  ;;  %s2873_s22 = scalar_lea.vmem %s234_s8, 32 }
 0x129   :  { %p2870_p9 = scmp.ne.s32.totalorder %s234_s8, %s2869_s5  ;;  %p2874_p10 = scmp.lt.s32.totalorder %s234_s8, %s234_s8 }
 0x12a   :  { %p2875_p11 = scmp.lt.s32.totalorder %s2873_s22, %s2869_s5 }
 0x12c   :  { %p2876_p12 = por %p2875_p11, %p2874_p10 }
 0x12e   :  { %p2877_p13 = pnand %p2876_p12, %p2870_p9 }
 0x130   :  { %2880 = shalt.err (!%p2877_p13)
}
 0x131   :  { %236 = dma.hbm_to_vmem [thread:$0]  %s3164_s3, 16, %s234_s8, [#allocation17]  }
 0x132   :  { %s2881_s30 = scalar_lea.hbm %s3179_s24, 16 }
 0x133   :  { %p2882_p0 = scmp.ne.s32.totalorder %s3179_s24, %s2881_s30  ;;  %p2885_p1 = scmp.lt.u32.totalorder %s2881_s30, %s3179_s24 }
 0x135   :  { %p2887_p2 = pnand %p2885_p1, %p2882_p0 }
 0x137   :  { %2890 = shalt.err (!%p2887_p2)
}
 0x138   :  { %s2891_s23 = scalar_lea.vmem %s256_s16, 16  ;;  %s2895_s19 = scalar_lea.vmem %s256_s16, 32 }
 0x139   :  { %p2892_p3 = scmp.ne.s32.totalorder %s256_s16, %s2891_s23  ;;  %p2896_p4 = scmp.lt.s32.totalorder %s256_s16, %s256_s16 }
 0x13a   :  { %p2897_p5 = scmp.lt.s32.totalorder %s2895_s19, %s2891_s23 }
 0x13c   :  { %p2898_p6 = por %p2897_p5, %p2896_p4 }
 0x13e   :  { %p2899_p7 = pnand %p2898_p6, %p2892_p3 }
 0x140   :  { %2902 = shalt.err (!%p2899_p7)
}
 0x141   :  { %s3530_s26 = sld [smem:[#allocation56_spill]]  ;;  %s3019_s3 = smov [#allocation24]  }
 0x142   :  { %258 = dma.hbm_to_vmem [thread:$0]  %s3179_s24, 16, %s256_s16, [#allocation20]  }
 0x143   :  { %s277_s13 = sshll.u32 %s3019_s3, 4  ;;  %s3020_s28 = smov [#allocation27]   ;;  %s278_s13 = int_to_ptr.vmem [resolvable:$true] %s277_s13 }
 0x144   :  { %s299_s14 = sshll.u32 %s3020_s28, 4  ;;  %s300_s14 = int_to_ptr.vmem [resolvable:$true] %s299_s14 }
 0x147   :  { %s2903_s9 = scalar_lea.hbm %s3530_s26, 16 }
 0x148   :  { %p2904_p8 = scmp.ne.s32.totalorder %s3530_s26, %s2903_s9  ;;  %p2907_p9 = scmp.lt.u32.totalorder %s2903_s9, %s3530_s26 }
 0x14a   :  { %p2909_p10 = pnand %p2907_p9, %p2904_p8 }
 0x14c   :  { %2912 = shalt.err (!%p2909_p10)
}
 0x14d   :  { %s2913_s1 = scalar_lea.vmem %s278_s13, 16  ;;  %s2917_s17 = scalar_lea.vmem %s278_s13, 32 }
 0x14e   :  { %p2914_p11 = scmp.ne.s32.totalorder %s278_s13, %s2913_s1  ;;  %p2918_p12 = scmp.lt.s32.totalorder %s278_s13, %s278_s13 }
 0x14f   :  { %p2919_p13 = scmp.lt.s32.totalorder %s2917_s17, %s2913_s1 }
 0x151   :  { %p2920_p0 = por %p2919_p13, %p2918_p12 }
 0x153   :  { %p2921_p1 = pnand %p2920_p0, %p2914_p11 }
 0x155   :  { %2924 = shalt.err (!%p2921_p1)
}
 0x156   :  { %280 = dma.hbm_to_vmem [thread:$0]  %s3530_s26, 16, %s278_s13, [#allocation23]  }
 0x157   :  { %s2925_s24 = scalar_lea.hbm %s3209_s29, 16 }
 0x158   :  { %p2926_p2 = scmp.ne.s32.totalorder %s3209_s29, %s2925_s24  ;;  %p2929_p3 = scmp.lt.u32.totalorder %s2925_s24, %s3209_s29 }
 0x15a   :  { %p2931_p4 = pnand %p2929_p3, %p2926_p2 }
 0x15c   :  { %2934 = shalt.err (!%p2931_p4)
}
 0x15d   :  { %s2935_s2 = scalar_lea.vmem %s300_s14, 16  ;;  %s2939_s7 = scalar_lea.vmem %s300_s14, 32 }
 0x15e   :  { %p2936_p5 = scmp.ne.s32.totalorder %s300_s14, %s2935_s2  ;;  %p2940_p6 = scmp.lt.s32.totalorder %s300_s14, %s300_s14 }
 0x15f   :  { %p2941_p7 = scmp.lt.s32.totalorder %s2939_s7, %s2935_s2 }
 0x161   :  { %p2942_p8 = por %p2941_p7, %p2940_p6 }
 0x163   :  { %p2943_p9 = pnand %p2942_p8, %p2936_p5 }
 0x165   :  { %2946 = shalt.err (!%p2943_p9)
}
 0x166   :  { %302 = dma.hbm_to_vmem [thread:$0]  %s3209_s29, 16, %s300_s14, [#allocation26]  }
 0x167   :  { %2947 = dma.done.wait [#allocation3], 256  }
 0x168   :  { %2948 = vsyncadd [#allocation3], 4294967040 }
 0x169   :  { %2949 = dma.done.wait [#allocation5], 144  }
 0x16a   :  { %2950 = vsyncadd [#allocation5], 4294967152 }
 0x16b   :  { %2951 = dma.done.wait [#allocation8], 528  }
 0x16c   :  { %2952 = vsyncadd [#allocation8], 4294966768 }
 0x16d   :  { %2953 = dma.done.wait [#allocation11], 32  }
 0x16e   :  { %2954 = vsyncadd [#allocation11], 4294967264 }
 0x16f   :  { %2955 = dma.done.wait [#allocation14], 144  }
 0x170   :  { %2956 = vsyncadd [#allocation14], 4294967152 }
 0x171   :  { %2957 = dma.done.wait [#allocation17], 32  }
 0x172   :  { %2958 = vsyncadd [#allocation17], 4294967264 }
 0x173   :  { %2959 = dma.done.wait [#allocation20], 32  }
 0x174   :  { %2960 = vsyncadd [#allocation20], 4294967264 }
 0x175   :  { %2961 = dma.done.wait [#allocation23], 32  }
 0x176   :  { %2962 = vsyncadd [#allocation23], 4294967264 }
 0x177   :  { %2963 = dma.done.wait [#allocation26], 32  }
 0x178   :  { %2964 = vsyncadd [#allocation26], 4294967264  ;;  %s3531_s10 = sld [smem:[#allocation38_spill]]  ;;  %s3532_s29 = sld [smem:[#allocation37_spill]]  ;;  %vm364_vm0 = vcmask 64512   ;;  %v356_v0 = vld [vmem:[#allocation4] sm:$0xff] }
 0x179   :  { %s3533_s27 = sld [smem:[#allocation39_spill]]  ;;  %2255 = vmatprep.subr.mxu0 %v356_v0  ;;  %v2132_v4 = vld [vmem:[#allocation6] ss:$0 sm:$0xff]  ;;  %vm531_vm1 = vcmask 261120   ;;  %s3534_s12 = sld [smem:[#allocation42_spill]] }
 0x17a   :  { %2256 = vmatpush3.msra.mxu0 %v356_v0  ;;  %s3535_s11 = sld [smem:[#allocation45_spill]]  ;;  %s3536_s4 = sld [smem:[#allocation48_spill]] }
 0x17b   :  { %s3537_s15 = sld [smem:[#allocation40_spill]]  ;;  %s3538_s0 = sld [smem:[#allocation41_spill]] }
 0x17c   :  { %s3539_s20 = sld [smem:[#allocation43_spill]]  ;;  %s3540_s8 = sld [smem:[#allocation46_spill]] }
 0x17d   :  { %s3541_s6 = sld [smem:[#allocation44_spill]]  ;;  %s3542_s16 = sld [smem:[#allocation47_spill]] }
 0x17e   :  { %v446_v1 = vld [vmem:[%s3531_s10] sm:$0xff]  ;;  %v3295_v3 = vld [vmem:[%s3532_s29 + $0x8] sm:$0xff]  ;;  %s3543_s18 = sld [smem:[#allocation49_spill]]  ;;  %s3544_s5 = sld [smem:[#allocation50_spill]] }
 0x17f   :  { %v3292_v2 = vld [vmem:[%s3532_s29] sm:$0xff]  ;;  %2260 = vmatprep.subr.mxu1 %v446_v1  ;;  %s3545_s22 = sld [smem:[#allocation51_spill]]  ;;  %s3548_s30 = sld [smem:[#allocation52_spill]] }
 0x180   :  { %2257 = vmatprep.mubr.msk.f32.mxu0 %vm364_vm0, %v3292_v2  ;;  %2261 = vmatpush3.msra.mxu1 %v446_v1  ;;  %v2135_v5 = vld [vmem:[%s3533_s27] ss:$0 sm:$0xff]  ;;  %s3549_s23 = sld [smem:[#allocation53_spill]]  ;;  %s3550_s19 = sld [smem:[#allocation54_spill]] }
 0x181   :  { %2262 = vmatprep.mubr.msk.f32.mxu1 %vm364_vm0, %v3292_v2  ;;  %2258 = vmatmul.mubr.msk.f32.vlgmr.msra.gmra.mrb[0].mxu0 %vm364_vm0, %v3295_v3  ;;  %s3551_s26 = sld [smem:[#allocation55_spill]] }
 0x182   :  { %2263 = vmatmul.mubr.msk.f32.vlgmr.msra.gmra.mrb[0].mxu1 %vm364_vm0, %v3295_v3 }
 0x254   :  { %v2259_v6 = vpop.f32.mrb[0].mxu0 }
 0x255   :  { %v2264_v7 = vpop.f32.mrb[0].mxu1  ;;  %v443_v8 = vadd.f32 %v2259_v6, %v2132_v4  ;;  %v437_v10 = vpop.f32.mrb[1].mxu0 }
 0x256   :  { %v526_v9 = vadd.f32 %v2264_v7, %v2135_v5  ;;  %v520_v11 = vpop.f32.mrb[1].mxu1  ;;  %v438_v12 = vadd.f32 %v2132_v4, %v437_v10 }
 0x257   :  { %v521_v13 = vadd.f32 %v2135_v5, %v520_v11  ;;  %v530_v15 = vmul.f32 %v443_v8, %v443_v8 }
 0x258   :  { %v583_v14 = vadd.f32 %v526_v9, %v443_v8  ;;  %v555_v16 = vmul.f32 %v526_v9, %v526_v9  ;;  %v529_v18 = vmul.f32 %v438_v12, %v438_v12 }
 0x259   :  { %v582_v17 = vadd.f32 %v521_v13, %v438_v12  ;;  %v554_v19 = vmul.f32 %v521_v13, %v521_v13  ;;  %v535_v21 = vsel %vm531_vm1, %v530_v15, 0.0 }
 0x25a   :  { %v3306_v20 = vmul.f32 0.5, %v583_v14  ;;  %536 = vadd.xlane.f32.xlu1 %v535_v21  ;;  %v532_v23 = vsel %vm531_vm1, %v529_v18, 0.0  ;;  %v559_v24 = vsel %vm531_vm1, %v555_v16, 0.0 }
 0x25b   :  { %v3309_v22 = vmul.f32 0.5, %v582_v17  ;;  %533 = vadd.xlane.f32.xlu0 %v532_v23  ;;  %v556_v25 = vsel %vm531_vm1, %v554_v19, 0.0 }
 0x25c   :  { %v589_v26 = vmul.f32 %v3306_v20, %v3306_v20 }
 0x25d   :  { %v588_v27 = vmul.f32 %v3309_v22, %v3309_v22 }
 0x25e   :  { %560 = vadd.xlane.f32.xlu1 %v559_v24  ;;  %v593_v28 = vsel %vm531_vm1, %v589_v26, 0.0  ;;  %v677_v26 = vld [vmem:[%s3534_s12] sm:$0xff] }
 0x25f   :  { %557 = vadd.xlane.f32.xlu0 %v556_v25  ;;  %v590_v29 = vsel %vm531_vm1, %v588_v27, 0.0  ;;  %v678_v27 = vld [vmem:[%s3534_s12 + $0x8] sm:$0xff] }
 0x262   :  { %594 = vadd.xlane.f32.xlu1 %v593_v28  ;;  %v2379_v28 = vpack.c.bf16 %v678_v27, %v677_v26 }
 0x263   :  { %591 = vadd.xlane.f32.xlu0 %v590_v29  ;;  %v780_v29 = vld [vmem:[%s3535_s11] sm:$0xff] }
 0x264   :  { %2380 = vmatprep.subr.bf16.mxu0 %v2379_v28 }
 0x265   :  { %2382 = vmatpush3.bf16.msra.mxu0 %v2379_v28 }
 0x2e7   :  { %v537_v30 = vpop.xlane.xlu1 %536 }
 0x2e8   :  { %v539_v31 = vadd.f32 1.0, %v537_v30  ;;  %v534_v32 = vpop.xlane.xlu0 %533  ;;  %v781_v30 = vld [vmem:[%s3535_s11 + $0x8] sm:$0xff] }
 0x2e9   :  { %v538_v33 = vadd.f32 1.0, %v534_v32  ;;  %v679_v32 = vld [vmem:[%s3534_s12 + $0x10] sm:$0xff] }
 0x2ea   :  { %2513 = vrsqrt.f32 %v539_v31  ;;  %vm549_vm2 = vcmp.eq.f32.partialorder %v539_v31, inf  ;;  %vm551_vm3 = vcmp.eq.f32.partialorder %v539_v31, 0.0  ;;  %v552_v43 = vand.u32 2147483648, %v539_v31 }
 0x2eb   :  { %2515 = vrsqrt.f32 %v538_v33  ;;  %v561_v34 = vpop.xlane.xlu1 %560  ;;  %vm542_vm4 = vcmp.eq.f32.partialorder %v538_v33, inf  ;;  %vm544_vm5 = vcmp.eq.f32.partialorder %v538_v33, 0.0  ;;  %v545_v47 = vand.u32 2147483648, %v538_v33 }
 0x2ec   :  { %v563_v35 = vadd.f32 1.0, %v561_v34  ;;  %v558_v36 = vpop.xlane.xlu0 %557  ;;  %v782_v34 = vld [vmem:[%s3535_s11 + $0x10] sm:$0xff] }
 0x2ed   :  { %v562_v37 = vadd.f32 1.0, %v558_v36  ;;  %v783_v36 = vld [vmem:[%s3535_s11 + $0x18] sm:$0xff] }
 0x2ee   :  { %2517 = vrsqrt.f32 %v563_v35  ;;  %vm573_vm6 = vcmp.eq.f32.partialorder %v563_v35, inf  ;;  %v576_v48 = vand.u32 2147483648, %v563_v35  ;;  %vm575_vm7 = vcmp.eq.f32.partialorder %v563_v35, 0.0 }
 0x2ef   :  { %2519 = vrsqrt.f32 %v562_v37  ;;  %vm566_vm8 = vcmp.eq.f32.partialorder %v562_v37, inf  ;;  %v569_v52 = vand.u32 2147483648, %v562_v37  ;;  %vm568_vm9 = vcmp.eq.f32.partialorder %v562_v37, 0.0  ;;  %v595_v63 = vpop.xlane.xlu1 %594 }
 0x2f0   :  { %v592_v4 = vpop.xlane.xlu0 %591 }
 0x2f4   :  { %v2514_v38 = vpop.eup %2513 }
 0x2f5   :  { %v2516_v39 = vpop.eup %2515  ;;  %v548_v40 = vmul.f32 %v2514_v38, %v539_v31  ;;  %v877_v38 = vld [vmem:[%s3536_s4] sm:$0xff] }
 0x2f6   :  { %v541_v41 = vmul.f32 %v2516_v39, %v538_v33  ;;  %v878_v39 = vld [vmem:[%s3536_s4 + $0x8] sm:$0xff] }
 0x2f7   :  { %v550_v45 = vsel %vm549_vm2, %v539_v31, %v548_v40  ;;  %v2387_v31 = vpack.c.bf16 %v781_v30, %v780_v29  ;;  %v2395_v40 = vpack.c.bf16 %v878_v39, %v877_v38  ;;  %v2148_v38 = vld [vmem:[%s3543_s18] ss:$0 sm:$0xff] }
 0x2f8   :  { %v2518_v42 = vpop.eup %2517  ;;  %v543_v49 = vsel %vm542_vm4, %v538_v33, %v541_v41  ;;  %v553_v53 = vsel %vm551_vm3, %v552_v43, %v550_v45  ;;  %v680_v33 = vld [vmem:[%s3534_s12 + $0x18] sm:$0xff]  ;;  %vm3419_vm4 = vmpackc.low %vm531_vm1, %vm531_vm1 }
 0x2f9   :  { %v2520_v44 = vpop.eup %2519  ;;  %v572_v46 = vmul.f32 %v2518_v42, %v563_v35  ;;  %v546_v57 = vsel %vm544_vm5, %v545_v47, %v543_v49  ;;  %2388 = vmatprep.subr.bf16.mxu1 %v2387_v31 }
 0x2fa   :  { %v565_v50 = vmul.f32 %v2520_v44, %v562_v37  ;;  %2390 = vmatpush3.bf16.msra.mxu1 %v2387_v31 }
 0x2fb   :  { %v574_v51 = vsel %vm573_vm6, %v563_v35, %v572_v46  ;;  %v2383_v35 = vpack.c.bf16 %v680_v33, %v679_v32 }
 0x2fc   :  { %v577_v54 = vsel %vm575_vm7, %v576_v48, %v574_v51  ;;  %v567_v55 = vsel %vm566_vm8, %v562_v37, %v565_v50  ;;  %v2391_v37 = vpack.c.bf16 %v783_v36, %v782_v34  ;;  %v2138_v48 = vld [vmem:[%s3537_s15] ss:$0 sm:$0xff] }
 0x2fd   :  { %v579_v56 = vadd.f32 %v577_v54, %v553_v53  ;;  %v570_v58 = vsel %vm568_vm9, %v569_v52, %v567_v55  ;;  %2384 = vmatprep.subr.bf16.mxu0 %v2383_v35  ;;  %v2139_v52 = vld [vmem:[%s3538_s0] ss:$0 sm:$0xff]  ;;  %vm1141_vm9 = vcmask 130048  }
 0x2fe   :  { %v578_v59 = vadd.f32 %v570_v58, %v546_v57  ;;  %2392 = vmatprep.subr.bf16.mxu1 %v2391_v37  ;;  %2386 = vmatpush3.bf16.msra.mxu0 %v2383_v35  ;;  %v879_v58 = vld [vmem:[%s3536_s4 + $0x10] sm:$0xff] }
 0x2ff   :  { %v581_v60 = vmul.f32 0.5, %v579_v56  ;;  %2394 = vmatpush3.bf16.msra.mxu1 %v2391_v37  ;;  %2396 = vmatprep.subr.bf16.mxu0 %v2395_v40 }
 0x300   :  { %v580_v61 = vmul.f32 0.5, %v578_v59  ;;  %v880_v59 = vld [vmem:[%s3536_s4 + $0x18] sm:$0xff] }
 0x301   :  { %v587_v62 = vmul.f32 %v581_v60, %v581_v60 }
 0x302   :  { %v586_v0 = vmul.f32 %v580_v61, %v580_v61 }
 0x303   :  { %v597_v1 = vsub.f32 %v587_v62, %v595_v63  ;;  %v2399_v63 = vpack.c.bf16 %v880_v59, %v879_v58 }
 0x304   :  { %v596_v5 = vsub.f32 %v586_v0, %v592_v4 }
 0x305   :  { %v599_v6 = vand.u32 2147483647, %v597_v1 }
 0x306   :  { %v598_v7 = vand.u32 2147483647, %v596_v5 }
 0x307   :  { %v601_v8 = vmax.f32 %v599_v6, 1e-08 }
 0x308   :  { %v600_v9 = vmax.f32 %v598_v7, 1e-08 }
 0x309   :  { %2521 = vrsqrt.f32 %v601_v8 }
 0x30a   :  { %2523 = vrsqrt.f32 %v600_v9 }
 0x313   :  { %v2522_v10 = vpop.eup %2521 }
 0x314   :  { %v2524_v11 = vpop.eup %2523  ;;  %v605_v12 = vmul.f32 %v2522_v10, %v3306_v20 }
 0x315   :  { %v604_v13 = vmul.f32 %v2524_v11, %v3309_v22 }
 0x316   :  { %v609_v14 = vsel %vm531_vm1, %v605_v12, 0.0 }
 0x317   :  { %610 = vadd.xlane.f32.xlu1 %v609_v14  ;;  %v606_v15 = vsel %vm531_vm1, %v604_v13, 0.0 }
 0x318   :  { %607 = vadd.xlane.f32.xlu0 %v606_v15 }
 0x3a4   :  { %v611_v16 = vpop.xlane.xlu1 %610 }
 0x3a5   :  { %v614_v17 = vmul.f32 0.03125, %v611_v16  ;;  %v608_v18 = vpop.xlane.xlu0 %607 }
 0x3a6   :  { %v613_v19 = vmul.f32 0.03125, %v608_v18  ;;  %v2144_v18 = vld [vmem:[%s3540_s8] ss:$0 sm:$0xff] }
 0x3a7   :  { %v616_v21 = vsub.f32 %v605_v12, %v614_v17  ;;  %v2140_v17 = vld [vmem:[%s3539_s20] ss:$0 sm:$0xff] }
 0x3a8   :  { %v615_v20 = vsub.f32 %v604_v13, %v613_v19 }
 0x3a9   :  { %v618_v22 = vmul.f32 %v616_v21, %v616_v21 }
 0x3aa   :  { %v617_v23 = vmul.f32 %v615_v20, %v615_v20 }
 0x3ab   :  { %v622_v24 = vsel %vm531_vm1, %v618_v22, 0.0 }
 0x3ac   :  { %623 = vadd.xlane.f32.xlu1 %v622_v24  ;;  %v619_v25 = vsel %vm531_vm1, %v617_v23, 0.0  ;;  %v2143_v23 = vld [vmem:[%s3541_s6] ss:$0 sm:$0xff] }
 0x3ad   :  { %620 = vadd.xlane.f32.xlu0 %v619_v25  ;;  %v2147_v25 = vld [vmem:[%s3542_s16] ss:$0 sm:$0xff] }
 0x439   :  { %v624_v41 = vpop.xlane.xlu1 %623 }
 0x43a   :  { %v626_v42 = vmul.f32 0.03125, %v624_v41  ;;  %v621_v43 = vpop.xlane.xlu0 %620 }
 0x43b   :  { %v625_v44 = vmul.f32 0.03125, %v621_v43 }
 0x43c   :  { %v628_v45 = vadd.f32 1e-05, %v626_v42 }
 0x43d   :  { %v627_v46 = vadd.f32 1e-05, %v625_v44 }
 0x43e   :  { %2525 = vrsqrt.f32 %v628_v45 }
 0x43f   :  { %2527 = vrsqrt.f32 %v627_v46 }
 0x448   :  { %v2526_v47 = vpop.eup %2525 }
 0x449   :  { %v2528_v49 = vpop.eup %2527  ;;  %v632_v50 = vmul.f32 %v2526_v47, %v616_v21  ;;  %v2151_v47 = vld [vmem:[%s3544_s5] ss:$0 sm:$0xff] }
 0x44a   :  { %v631_v51 = vmul.f32 %v2528_v49, %v615_v20 }
 0x44b   :  { %v641_v53 = vmul.f32 %v2138_v48, %v632_v50 }
 0x44c   :  { %v640_v54 = vmul.f32 %v2138_v48, %v631_v51 }
 0x44d   :  { %v650_v55 = vadd.f32 %v2139_v52, %v641_v53 }
 0x44e   :  { %v649_v56 = vadd.f32 %v2139_v52, %v640_v54 }
 0x44f   :  { %v3339_v57 = vmax.f32 %v650_v55, 0.0 }
 0x450   :  { %v3343_v60 = vmax.f32 %v649_v56, 0.0 }
 0x451   :  { %v654_v61 = vmul.f32 %v3339_v57, %v3339_v57 }
 0x452   :  { %2273 = vmatprep.mubr.msk.f32.mxu0 %vm531_vm1, %v3343_v60  ;;  %2284 = vmatprep.mubr.msk.f32.mxu1 %vm531_vm1, %v3343_v60  ;;  %v653_v62 = vmul.f32 %v3343_v60, %v3343_v60 }
 0x453   :  { %2274 = vmatmul.mubr.msk.f32.vlgmr.msra.gmra.mrb[2].mxu0 %vm531_vm1, %v3339_v57  ;;  %2285 = vmatmul.mubr.msk.f32.vlgmr.msra.gmra.mrb[2].mxu1 %vm531_vm1, %v3339_v57  ;;  %v658_v0 = vsel %vm531_vm1, %v654_v61, 0.0 }
 0x454   :  { %2398 = vmatpush3.bf16.msra.mxu0 %v2395_v40  ;;  %659 = vadd.xlane.f32.xlu1 %v658_v0  ;;  %v655_v1 = vsel %vm531_vm1, %v653_v62, 0.0 }
 0x455   :  { %2295 = vmatprep.mubr.msk.f32.mxu0 %vm531_vm1, %v3343_v60  ;;  %656 = vadd.xlane.f32.xlu0 %v655_v1 }
 0x456   :  { %2400 = vmatprep.subr.bf16.mxu0 %v2399_v63 }
 0x458   :  { %2402 = vmatpush3.bf16.msra.mxu0 %v2399_v63 }
 0x45b   :  { %2296 = vmatmul.mubr.msk.f32.vlgmr.msra.gmra.mrb[4].mxu0 %vm531_vm1, %v3339_v57 }
 0x4e1   :  { %v660_v4 = vpop.xlane.xlu1 %659 }
 0x4e2   :  { %v657_v5 = vpop.xlane.xlu0 %656  ;;  %v662_v6 = vadd.f32 1.0, %v660_v4 }
 0x4e3   :  { %v661_v7 = vadd.f32 1.0, %v657_v5 }
 0x4e4   :  { %2529 = vrsqrt.f32 %v662_v6  ;;  %vm672_vm10 = vcmp.eq.f32.partialorder %v662_v6, inf  ;;  %v675_v13 = vand.u32 2147483648, %v662_v6  ;;  %vm674_vm12 = vcmp.eq.f32.partialorder %v662_v6, 0.0 }
 0x4e5   :  { %2531 = vrsqrt.f32 %v661_v7  ;;  %vm665_vm11 = vcmp.eq.f32.partialorder %v661_v7, inf  ;;  %v668_v15 = vand.u32 2147483648, %v661_v7  ;;  %vm667_vm13 = vcmp.eq.f32.partialorder %v661_v7, 0.0 }
 0x4ee   :  { %v2530_v8 = vpop.eup %2529 }
 0x4ef   :  { %v2532_v9 = vpop.eup %2531  ;;  %v671_v10 = vmul.f32 %v2530_v8, %v662_v6 }
 0x4f0   :  { %v664_v11 = vmul.f32 %v2532_v9, %v661_v7 }
 0x4f1   :  { %v673_v12 = vsel %vm672_vm10, %v662_v6, %v671_v10 }
 0x4f2   :  { %v666_v14 = vsel %vm665_vm11, %v661_v7, %v664_v11  ;;  %v3363_v16 = vsel %vm674_vm12, %v675_v13, %v673_v12 }
 0x4f3   :  { %v3367_v19 = vsel %vm667_vm13, %v668_v15, %v666_v14  ;;  %v689_v21 = vmul.f32 %v2140_v17, %v3363_v16  ;;  %v792_v20 = vmul.f32 %v2144_v18, %v3363_v16  ;;  %v889_v43 = vmul.f32 %v2148_v38, %v3363_v16 }
 0x4f4   :  { %v688_v26 = vmul.f32 %v2140_v17, %v3367_v19  ;;  %v791_v27 = vmul.f32 %v2144_v18, %v3367_v19  ;;  %v888_v48 = vmul.f32 %v2148_v38, %v3367_v19  ;;  %v1236_v38 = vld [vmem:[%s3545_s22 + $0x8] sm:$0xff] }
 0x526   :  { %v2275_v22 = vpop.f32.mrb[2].mxu0  ;;  %v2286_v24 = vpop.f32.mrb[2].mxu1 }
 0x527   :  { %v768_v28 = vadd.f32 %v2275_v22, %v689_v21  ;;  %v865_v29 = vadd.f32 %v2286_v24, %v792_v20  ;;  %v762_v30 = vpop.f32.mrb[3].mxu0  ;;  %v859_v31 = vpop.f32.mrb[3].mxu1 }
 0x528   :  { %v763_v32 = vadd.f32 %v762_v30, %v688_v26  ;;  %v860_v33 = vadd.f32 %v859_v31, %v791_v27 }
 0x529   :  { %v779_v34 = vadd.f32 %v2143_v23, %v768_v28  ;;  %v876_v35 = vadd.f32 %v2147_v25, %v865_v29 }
 0x52a   :  { %v778_v36 = vadd.f32 %v2143_v23, %v763_v32  ;;  %v875_v37 = vadd.f32 %v2147_v25, %v860_v33 }
 0x52b   :  { %v1015_v39 = vmax.f32 %v876_v35, 0.0  ;;  %v975_v41 = vmax.f32 %v779_v34, 0.0 }
 0x52c   :  { %v1014_v40 = vmax.f32 %v875_v37, 0.0  ;;  %v974_v44 = vmax.f32 %v778_v36, 0.0  ;;  %v1235_v37 = vld [vmem:[%s3545_s22] sm:$0xff] }
 0x52d   :  { %v1017_v42 = vadd.f32 1e-06, %v1015_v39  ;;  %v977_v54 = vadd.f32 1e-06, %v975_v41 }
 0x52e   :  { %v1016_v45 = vadd.f32 1e-06, %v1014_v40  ;;  %v2297_v46 = vpop.f32.mrb[4].mxu0  ;;  %v976_v59 = vadd.f32 1e-06, %v974_v44 }
 0x52f   :  { %v3379_v49 = vmul.f32 %v1017_v42, %v1017_v42  ;;  %v962_v50 = vadd.f32 %v2297_v46, %v889_v43  ;;  %v956_v51 = vpop.f32.mrb[5].mxu0  ;;  %v3397_v1 = vmul.f32 %v977_v54, %v977_v54 }
 0x530   :  { %v3381_v52 = vmul.f32 %v1016_v45, %v1016_v45  ;;  %v957_v53 = vadd.f32 %v956_v51, %v888_v48  ;;  %v3400_v5 = vmul.f32 %v976_v59, %v976_v59  ;;  %v2413_v45 = vpack.c.bf16 %v1236_v38, %v1235_v37 }
 0x531   :  { %v3383_v55 = vadd.f32 %v2151_v47, %v962_v50  ;;  %v1023_v56 = vsel %vm531_vm1, %v3379_v49, 0.0  ;;  %v1041_v58 = vmul.f32 %v3379_v49, %v3379_v49  ;;  %v983_v7 = vsel %vm531_vm1, %v3397_v1, 0.0 }
 0x532   :  { %v3389_v61 = vadd.f32 %v2151_v47, %v957_v53  ;;  %1024 = vadd.xlane.f32.xlu1 %v1023_v56  ;;  %v1020_v62 = vsel %vm531_vm1, %v3381_v52, 0.0  ;;  %v1040_v63 = vmul.f32 %v3381_v52, %v3381_v52  ;;  %v1001_v8 = vmul.f32 %v3397_v1, %v3397_v1 }
 0x533   :  { %1021 = vadd.xlane.f32.xlu0 %v1020_v62  ;;  %v1045_v4 = vsel %vm531_vm1, %v1041_v58, 0.0  ;;  %v980_v9 = vsel %vm531_vm1, %v3400_v5, 0.0  ;;  %v1000_v10 = vmul.f32 %v3400_v5, %v3400_v5  ;;  %v1237_v62 = vld [vmem:[%s3545_s22 + $0x10] sm:$0xff] }
 0x534   :  { %v2409_v0 = vpack.c.bf16 %v3383_v55, %v3389_v61  ;;  %v1042_v6 = vsel %vm531_vm1, %v1040_v63, 0.0  ;;  %v1005_v11 = vsel %vm531_vm1, %v1001_v8, 0.0  ;;  %v1238_v63 = vld [vmem:[%s3545_s22 + $0x18] sm:$0xff] }
 0x535   :  { %v1002_v12 = vsel %vm531_vm1, %v1000_v10, 0.0 }
 0x536   :  { %2410 = vmatprep.subr.bf16.mxu0 %v2409_v0  ;;  %1046 = vadd.xlane.f32.xlu1 %v1045_v4 }
 0x537   :  { %2412 = vmatpush3.bf16.msra.mxu0 %v2409_v0  ;;  %1043 = vadd.xlane.f32.xlu0 %v1042_v6  ;;  %v2417_v6 = vpack.c.bf16 %v1238_v63, %v1237_v62 }
 0x53a   :  { %984 = vadd.xlane.f32.xlu1 %v983_v7 }
 0x53b   :  { %981 = vadd.xlane.f32.xlu0 %v980_v9 }
 0x53e   :  { %1006 = vadd.xlane.f32.xlu1 %v1005_v11 }
 0x53f   :  { %1003 = vadd.xlane.f32.xlu0 %v1002_v12  ;;  %v2158_v12 = vld [vmem:[%s3548_s30] ss:$0 sm:$0xff] }
 0x5bf   :  { %v1025_v13 = vpop.xlane.xlu1 %1024 }
 0x5c0   :  { %2533 = vrsqrt.f32 %v1025_v13  ;;  %v1022_v14 = vpop.xlane.xlu0 %1021  ;;  %vm1035_vm14 = vcmp.eq.f32.partialorder %v1025_v13, inf  ;;  %vm1037_vm15 = vcmp.eq.f32.partialorder %v1025_v13, 0.0  ;;  %v1038_v25 = vand.u32 2147483648, %v1025_v13 }
 0x5c1   :  { %2535 = vrsqrt.f32 %v1022_v14  ;;  %vm1028_vm2 = vcmp.eq.f32.partialorder %v1022_v14, inf  ;;  %v1031_v29 = vand.u32 2147483648, %v1022_v14  ;;  %vm1030_vm3 = vcmp.eq.f32.partialorder %v1022_v14, 0.0 }
 0x5c3   :  { %v1047_v15 = vpop.xlane.xlu1 %1046 }
 0x5c4   :  { %2537 = vrsqrt.f32 %v1047_v15  ;;  %v1044_v17 = vpop.xlane.xlu0 %1043 }
 0x5c5   :  { %2539 = vrsqrt.f32 %v1044_v17 }
 0x5c7   :  { %v985_v18 = vpop.xlane.xlu1 %984 }
 0x5c8   :  { %2541 = vrsqrt.f32 %v985_v18  ;;  %v982_v21 = vpop.xlane.xlu0 %981  ;;  %vm995_vm5 = vcmp.eq.f32.partialorder %v985_v18, inf  ;;  %v998_v46 = vand.u32 2147483648, %v985_v18  ;;  %vm997_vm6 = vcmp.eq.f32.partialorder %v985_v18, 0.0 }
 0x5c9   :  { %2543 = vrsqrt.f32 %v982_v21  ;;  %vm988_vm7 = vcmp.eq.f32.partialorder %v982_v21, inf  ;;  %vm990_vm8 = vcmp.eq.f32.partialorder %v982_v21, 0.0 }
 0x5ca   :  { %v2534_v20 = vpop.eup %2533 }
 0x5cb   :  { %v2536_v22 = vpop.eup %2535  ;;  %v1034_v23 = vmul.f32 %v2534_v20, %v1025_v13  ;;  %v1007_v24 = vpop.xlane.xlu1 %1006 }
 0x5cc   :  { %v1027_v26 = vmul.f32 %v2536_v22, %v1022_v14  ;;  %2545 = vrsqrt.f32 %v1007_v24  ;;  %v1004_v27 = vpop.xlane.xlu0 %1003 }
 0x5cd   :  { %v1036_v28 = vsel %vm1035_vm14, %v1025_v13, %v1034_v23  ;;  %2547 = vrsqrt.f32 %v1004_v27 }
 0x5ce   :  { %v2538_v30 = vpop.eup %2537  ;;  %v1029_v31 = vsel %vm1028_vm2, %v1022_v14, %v1027_v26  ;;  %v1039_v32 = vsel %vm1037_vm15, %v1038_v25, %v1036_v28 }
 0x5cf   :  { %v2540_v33 = vpop.eup %2539  ;;  %v1032_v34 = vsel %vm1030_vm3, %v1031_v29, %v1029_v31  ;;  %v1051_v35 = vmul.f32 %v2538_v30, %v1039_v32 }
 0x5d0   :  { %v1050_v36 = vmul.f32 %v2540_v33, %v1032_v34 }
 0x5d1   :  { %v1053_v39 = vmul.f32 %v1051_v35, %v3379_v49  ;;  %v991_v49 = vand.u32 2147483648, %v982_v21 }
 0x5d2   :  { %v2542_v40 = vpop.eup %2541  ;;  %v1052_v41 = vmul.f32 %v1050_v36, %v3381_v52 }
 0x5d3   :  { %v2544_v42 = vpop.eup %2543  ;;  %v994_v43 = vmul.f32 %v2542_v40, %v985_v18 }
 0x5d4   :  { %v987_v47 = vmul.f32 %v2544_v42, %v982_v21  ;;  %v2403_v48 = vpack.c.bf16 %v1053_v39, %v1052_v41 }
 0x5d5   :  { %v996_v50 = vsel %vm995_vm5, %v985_v18, %v994_v43 }
 0x5d6   :  { %v2546_v51 = vpop.eup %2545  ;;  %v989_v52 = vsel %vm988_vm7, %v982_v21, %v987_v47  ;;  %v999_v53 = vsel %vm997_vm6, %v998_v46, %v996_v50  ;;  %2405 = vmatprep.subr.msk.bf16.mxu1 %vm3419_vm4, %v2403_v48  ;;  %vm2079_vm6 = vcmask 31744  }
 0x5d7   :  { %v2548_v54 = vpop.eup %2547  ;;  %2408 = vmatpush3.bf16.xpose.msk.msra.mxu1 %vm3419_vm4, %v2403_v48  ;;  %v992_v56 = vsel %vm990_vm8, %v991_v49, %v989_v52  ;;  %v1011_v58 = vmul.f32 %v2546_v51, %v999_v53 }
 0x5d8   :  { %v1010_v59 = vmul.f32 %v2548_v54, %v992_v56  ;;  %2414 = vmatprep.subr.bf16.mxu1 %v2413_v45 }
 0x5d9   :  { %v1013_v4 = vmul.f32 %v1011_v58, %v3397_v1 }
 0x5da   :  { %v1012_v0 = vmul.f32 %v1010_v59, %v3400_v5 }
 0x5dc   :  { %2302 = vmatprep.mubr.msk.f32.mxu1 %vm531_vm1, %v1012_v0 }
 0x5de   :  { %2303 = vmatmul.mubr.msk.f32.vlgmr.msra.gmra.mrb[4].mxu1 %vm531_vm1, %v1013_v4 }
 0x5df   :  { %2416 = vmatpush3.bf16.msra.mxu1 %v2413_v45  ;;  %2320 = vmatprep.mubr.msk.f32.mxu1 %vm531_vm1, %v3389_v61 }
 0x5e0   :  { %2418 = vmatprep.subr.bf16.mxu1 %v2417_v6 }
 0x5e3   :  { %2420 = vmatpush3.bf16.msra.mxu1 %v2417_v6 }
 0x5e6   :  { %2321 = vmatmul.mubr.msk.f32.vlgmr.msra.gmra.mrb[6].mxu1 %vm531_vm1, %v3383_v55 }
 0x5e7   :  { %2336 = vmatprep.mubr.msk.f32.mxu1 %vm364_vm0, %v3292_v2 }
 0x6b1   :  { %v2304_v5 = vpop.f32.mrb[4].mxu1 }
 0x6b2   :  { %v1132_v7 = vpop.f32.mrb[5].mxu1  ;;  %v1226_v1 = vsel %vm1141_vm9, %v2304_v5, 0.0 }
 0x6b3   :  { %1227 = vadd.xlane.f32.xlu1 %v1226_v1  ;;  %2309 = vmatprep.mubr.msk.f32.mxu0 %vm1141_vm9, %v1132_v7  ;;  %v1223_v8 = vsel %vm1141_vm9, %v1132_v7, 0.0 }
 0x6b4   :  { %1224 = vadd.xlane.f32.xlu0 %v1223_v8  ;;  %2310 = vmatmul.mubr.msk.f32.vlgmr.msra.gmra.mrb[6].mxu0 %vm1141_vm9, %v2304_v5 }
 0x6b9   :  { %v2322_v61 = vpop.f32.mrb[6].mxu1 }
 0x6ba   :  { %v1318_v9 = vpop.f32.mrb[7].mxu1  ;;  %v1324_v17 = vadd.f32 %v2322_v61, %v2158_v12 }
 0x6bb   :  { %v1319_v20 = vadd.f32 %v2158_v12, %v1318_v9 }
 0x740   :  { %v1228_v55 = vpop.xlane.xlu1 %1227 }
 0x741   :  { %v1225_v10 = vpop.xlane.xlu0 %1224  ;;  %v1230_v11 = vadd.f32 1e-06, %v1228_v55 }
 0x742   :  { %v1229_v2 = vadd.f32 1e-06, %v1225_v10 }
 0x743   :  { %2549 = vrcp.f32 %v1230_v11 }
 0x744   :  { %2551 = vrcp.f32 %v1229_v2 }
 0x74d   :  { %v2550_v13 = vpop.eup %2549 }
 0x74e   :  { %v2552_v15 = vpop.eup %2551 }
 0x787   :  { %v2311_v14 = vpop.f32.mrb[6].mxu0 }
 0x788   :  { %v1234_v18 = vmul.f32 %v2550_v13, %v2311_v14  ;;  %v1214_v21 = vpop.f32.mrb[7].mxu0 }
 0x789   :  { %v1233_v22 = vmul.f32 %v2552_v15, %v1214_v21  ;;  %v2170_v21 = vld [vmem:[#allocation16] ss:$0 sm:$0xff] }
 0x78a   :  { %v1328_v23 = vadd.f32 %v1324_v17, %v1234_v18  ;;  %v2167_v18 = vld [vmem:[#allocation15] ss:$0 sm:$0xff] }
 0x78b   :  { %v1327_v24 = vadd.f32 %v1319_v20, %v1233_v22 }
 0x78c   :  { %v1358_v25 = vadd.f32 %v1328_v23, %v3339_v57  ;;  %v1330_v26 = vmul.f32 %v1328_v23, %v1328_v23  ;;  %v1578_v57 = vld [vmem:[#allocation13] sm:$0xff] }
 0x78d   :  { %v1357_v27 = vadd.f32 %v1327_v24, %v3343_v60  ;;  %v1329_v28 = vmul.f32 %v1327_v24, %v1327_v24  ;;  %2334 = vmatprep.subr.mxu1 %v1578_v57  ;;  %v1451_v23 = vld [vmem:[#allocation9] sm:$0xff]  ;;  %v1452_v24 = vld [vmem:[#allocation9 + $0x8] sm:$0xff] }
 0x78e   :  { %v1334_v29 = vsel %vm531_vm1, %v1330_v26, 0.0  ;;  %v1360_v30 = vmul.f32 0.5, %v1358_v25  ;;  %2335 = vmatpush3.msra.mxu1 %v1578_v57  ;;  %v1453_v25 = vld [vmem:[#allocation9 + $0x10] sm:$0xff] }
 0x78f   :  { %1335 = vadd.xlane.f32.xlu1 %v1334_v29  ;;  %v1331_v31 = vsel %vm531_vm1, %v1329_v28, 0.0  ;;  %v1359_v32 = vmul.f32 0.5, %v1357_v27  ;;  %2337 = vmatmul.mubr.msk.f32.vlgmr.msra.gmra.mrb[8].mxu1 %vm364_vm0, %v3295_v3  ;;  %v2171_v26 = vld [vmem:[#allocation18] ss:$0 sm:$0xff]  ;;  %v2421_v28 = vpack.c.bf16 %v1452_v24, %v1451_v23  ;;  %v1454_v29 = vld [vmem:[#allocation9 + $0x18] sm:$0xff] }
 0x790   :  { %1332 = vadd.xlane.f32.xlu0 %v1331_v31  ;;  %v1364_v33 = vmul.f32 %v1360_v30, %v1360_v30  ;;  %v2425_v31 = vpack.c.bf16 %v1454_v29, %v1453_v25  ;;  %v2163_v23 = vld [vmem:[#allocation10] ss:$0 sm:$0xff] }
 0x791   :  { %v1363_v34 = vmul.f32 %v1359_v32, %v1359_v32  ;;  %2422 = vmatprep.subr.bf16.mxu0 %v2421_v28 }
 0x792   :  { %v1368_v35 = vsel %vm531_vm1, %v1364_v33, 0.0  ;;  %2424 = vmatpush3.bf16.msra.mxu0 %v2421_v28 }
 0x793   :  { %1369 = vadd.xlane.f32.xlu1 %v1368_v35  ;;  %v1365_v36 = vsel %vm531_vm1, %v1363_v34, 0.0  ;;  %2426 = vmatprep.subr.bf16.mxu0 %v2425_v31 }
 0x794   :  { %1366 = vadd.xlane.f32.xlu0 %v1365_v36 }
 0x796   :  { %2428 = vmatpush3.bf16.msra.mxu0 %v2425_v31 }
 0x81c   :  { %v1336_v60 = vpop.xlane.xlu1 %1335 }
 0x81d   :  { %v1338_v37 = vadd.f32 1.0, %v1336_v60  ;;  %v1333_v38 = vpop.xlane.xlu0 %1332 }
 0x81e   :  { %v1337_v39 = vadd.f32 1.0, %v1333_v38 }
 0x81f   :  { %2553 = vrsqrt.f32 %v1338_v37  ;;  %vm1348_vm10 = vcmp.eq.f32.partialorder %v1338_v37, inf  ;;  %v1351_v43 = vand.u32 2147483648, %v1338_v37  ;;  %vm1350_vm11 = vcmp.eq.f32.partialorder %v1338_v37, 0.0 }
 0x820   :  { %2555 = vrsqrt.f32 %v1337_v39  ;;  %vm1341_vm12 = vcmp.eq.f32.partialorder %v1337_v39, inf  ;;  %v1344_v46 = vand.u32 2147483648, %v1337_v39  ;;  %vm1343_vm13 = vcmp.eq.f32.partialorder %v1337_v39, 0.0  ;;  %v1370_v54 = vpop.xlane.xlu1 %1369 }
 0x821   :  { %v1367_v59 = vpop.xlane.xlu0 %1366 }
 0x829   :  { %v2554_v40 = vpop.eup %2553 }
 0x82a   :  { %v2556_v41 = vpop.eup %2555  ;;  %v1347_v42 = vmul.f32 %v2554_v40, %v1338_v37 }
 0x82b   :  { %v1340_v44 = vmul.f32 %v2556_v41, %v1337_v39 }
 0x82c   :  { %v1349_v45 = vsel %vm1348_vm10, %v1338_v37, %v1347_v42 }
 0x82d   :  { %v1352_v47 = vsel %vm1350_vm11, %v1351_v43, %v1349_v45  ;;  %v1342_v48 = vsel %vm1341_vm12, %v1337_v39, %v1340_v44  ;;  %v2161_v43 = vld [vmem:[%s3549_s23] ss:$0 sm:$0xff] }
 0x82e   :  { %v1354_v3 = vadd.f32 %v1352_v47, %v3363_v16  ;;  %v1345_v50 = vsel %vm1343_vm13, %v1344_v46, %v1342_v48  ;;  %v2162_v47 = vld [vmem:[#allocation7] ss:$0 sm:$0xff] }
 0x82f   :  { %v1353_v49 = vadd.f32 %v1345_v50, %v3367_v19 }
 0x830   :  { %v1356_v51 = vmul.f32 0.5, %v1354_v3 }
 0x831   :  { %v1355_v52 = vmul.f32 0.5, %v1353_v49 }
 0x832   :  { %v1362_v53 = vmul.f32 %v1356_v51, %v1356_v51 }
 0x833   :  { %v1361_v56 = vmul.f32 %v1355_v52, %v1355_v52 }
 0x834   :  { %v1372_v58 = vsub.f32 %v1362_v53, %v1370_v54 }
 0x835   :  { %v1371_v62 = vsub.f32 %v1361_v56, %v1367_v59  ;;  %v1681_v56 = vld [vmem:[#allocation2] sm:$0xff] }
 0x836   :  { %v1374_v63 = vand.u32 2147483647, %v1372_v58 }
 0x837   :  { %v1373_v0 = vand.u32 2147483647, %v1371_v62  ;;  %v1682_v62 = vld [vmem:[#allocation2 + $0x8] sm:$0xff] }
 0x838   :  { %v1376_v4 = vmax.f32 %v1374_v63, 1e-08  ;;  %v1764_v63 = vld [vmem:[%s3550_s19] sm:$0xff] }
 0x839   :  { %v1375_v6 = vmax.f32 %v1373_v0, 1e-08  ;;  %v1765_v0 = vld [vmem:[%s3550_s19 + $0x8] sm:$0xff] }
 0x83a   :  { %2557 = vrsqrt.f32 %v1376_v4  ;;  %v1878_v4 = vld [vmem:[%s3551_s26] sm:$0xff] }
 0x83b   :  { %2559 = vrsqrt.f32 %v1375_v6  ;;  %v2433_v6 = vpack.c.bf16 %v1765_v0, %v1764_v63 }
 0x83d   :  { %2434 = vmatprep.subr.bf16.mxu1 %v2433_v6 }
 0x83e   :  { %2436 = vmatpush3.bf16.msra.mxu1 %v2433_v6 }
 0x844   :  { %v2558_v5 = vpop.eup %2557 }
 0x845   :  { %v2560_v7 = vpop.eup %2559  ;;  %v1380_v16 = vmul.f32 %v2558_v5, %v1360_v30  ;;  %v1879_v5 = vld [vmem:[%s3551_s26 + $0x8] sm:$0xff] }
 0x846   :  { %v1379_v1 = vmul.f32 %v2560_v7, %v1359_v32  ;;  %v2441_v7 = vpack.c.bf16 %v1879_v5, %v1878_v4 }
 0x847   :  { %v1384_v19 = vsel %vm531_vm1, %v1380_v16, 0.0 }
 0x848   :  { %1385 = vadd.xlane.f32.xlu1 %v1384_v19  ;;  %v1381_v8 = vsel %vm531_vm1, %v1379_v1, 0.0  ;;  %v1880_v19 = vld [vmem:[%s3551_s26 + $0x10] sm:$0xff] }
 0x849   :  { %1382 = vadd.xlane.f32.xlu0 %v1381_v8 }
 0x862   :  { %v2338_v17 = vpop.f32.mrb[8].mxu1 }
 0x863   :  { %v1658_v20 = vadd.f32 %v2338_v17, %v2167_v18  ;;  %v1652_v22 = vpop.f32.mrb[9].mxu1 }
 0x864   :  { %v1653_v27 = vadd.f32 %v2167_v18, %v1652_v22 }
 0x865   :  { %v1669_v30 = vmul.f32 %v2170_v21, %v1658_v20 }
 0x866   :  { %v1668_v32 = vmul.f32 %v2170_v21, %v1653_v27  ;;  %v2166_v27 = vld [vmem:[#allocation12] ss:$0 sm:$0xff] }
 0x867   :  { %v3458_v33 = vadd.f32 %v2171_v26, %v1669_v30 }
 0x868   :  { %v3460_v34 = vadd.f32 %v2171_v26, %v1668_v32 }
 0x869   :  { %v1680_v35 = vmax.f32 %v3458_v33, 0.0 }
 0x86a   :  { %v1679_v36 = vmax.f32 %v3460_v34, 0.0 }
 0x86c   :  { %v2429_v57 = vpack.c.bf16 %v1680_v35, %v1679_v36 }
 0x86e   :  { %2430 = vmatprep.subr.bf16.mxu0 %v2429_v57 }
 0x8d5   :  { %v1386_v61 = vpop.xlane.xlu1 %1385 }
 0x8d6   :  { %v1388_v9 = vmul.f32 0.03125, %v1386_v61  ;;  %v1383_v55 = vpop.xlane.xlu0 %1382  ;;  %v1881_v61 = vld [vmem:[%s3551_s26 + $0x18] sm:$0xff] }
 0x8d7   :  { %v1387_v10 = vmul.f32 0.03125, %v1383_v55 }
 0x8d8   :  { %v1390_v11 = vsub.f32 %v1380_v16, %v1388_v9  ;;  %v1766_v16 = vld [vmem:[%s3550_s19 + $0x10] sm:$0xff]  ;;  %v2445_v9 = vpack.c.bf16 %v1881_v61, %v1880_v19 }
 0x8d9   :  { %v1389_v2 = vsub.f32 %v1379_v1, %v1387_v10  ;;  %v1767_v1 = vld [vmem:[%s3550_s19 + $0x18] sm:$0xff] }
 0x8da   :  { %v1392_v12 = vmul.f32 %v1390_v11, %v1390_v11  ;;  %v2437_v8 = vpack.c.bf16 %v1767_v1, %v1766_v16 }
 0x8db   :  { %v1391_v13 = vmul.f32 %v1389_v2, %v1389_v2 }
 0x8dc   :  { %v1396_v14 = vsel %vm531_vm1, %v1392_v12, 0.0  ;;  %2438 = vmatprep.subr.bf16.mxu1 %v2437_v8 }
 0x8dd   :  { %1397 = vadd.xlane.f32.xlu1 %v1396_v14  ;;  %v1393_v15 = vsel %vm531_vm1, %v1391_v13, 0.0  ;;  %2440 = vmatpush3.bf16.msra.mxu1 %v2437_v8 }
 0x8de   :  { %1394 = vadd.xlane.f32.xlu0 %v1393_v15 }
 0x96a   :  { %v1398_v60 = vpop.xlane.xlu1 %1397 }
 0x96b   :  { %v1400_v37 = vmul.f32 0.03125, %v1398_v60  ;;  %v1395_v38 = vpop.xlane.xlu0 %1394 }
 0x96c   :  { %v1399_v39 = vmul.f32 0.03125, %v1395_v38 }
 0x96d   :  { %v1402_v40 = vadd.f32 1e-05, %v1400_v37 }
 0x96e   :  { %v1401_v41 = vadd.f32 1e-05, %v1399_v39 }
 0x96f   :  { %2561 = vrsqrt.f32 %v1402_v40 }
 0x970   :  { %2563 = vrsqrt.f32 %v1401_v41 }
 0x979   :  { %v2562_v42 = vpop.eup %2561 }
 0x97a   :  { %v2564_v44 = vpop.eup %2563  ;;  %v1406_v45 = vmul.f32 %v2562_v42, %v1390_v11  ;;  %v1981_v42 = vld [vmem:[%s3204_s21] sm:$0xff] }
 0x97b   :  { %v1405_v46 = vmul.f32 %v2564_v44, %v1389_v2 }
 0x97c   :  { %v1415_v48 = vmul.f32 %v2161_v43, %v1406_v45  ;;  %v1983_v45 = vld [vmem:[%s3204_s21 + $0x10] sm:$0xff] }
 0x97d   :  { %v1414_v3 = vmul.f32 %v2161_v43, %v1405_v46  ;;  %v1982_v43 = vld [vmem:[%s3204_s21 + $0x8] sm:$0xff]  ;;  %v1984_v46 = vld [vmem:[%s3204_s21 + $0x18] sm:$0xff] }
 0x97e   :  { %v1424_v50 = vadd.f32 %v2162_v47, %v1415_v48  ;;  %v2449_v44 = vpack.c.bf16 %v1982_v43, %v1981_v42  ;;  %v2174_v48 = vld [vmem:[#allocation19] ss:$0 sm:$0xff] }
 0x97f   :  { %v1423_v49 = vadd.f32 %v2162_v47, %v1414_v3  ;;  %v2453_v47 = vpack.c.bf16 %v1984_v46, %v1983_v45 }
 0x980   :  { %v1426_v51 = vmax.f32 %v1424_v50, 0.0  ;;  %2450 = vmatprep.subr.bf16.mxu1 %v2449_v44 }
 0x981   :  { %v1425_v52 = vmax.f32 %v1423_v49, 0.0 }
 0x982   :  { %v1428_v53 = vmul.f32 %v1426_v51, %v1426_v51 }
 0x983   :  { %2331 = vmatprep.mubr.msk.f32.mxu0 %vm531_vm1, %v1425_v52  ;;  %v1427_v54 = vmul.f32 %v1425_v52, %v1425_v52 }
 0x984   :  { %2332 = vmatmul.mubr.msk.f32.vlgmr.msra.gmra.mrb[8].mxu0 %vm531_vm1, %v1426_v51  ;;  %v1432_v58 = vsel %vm531_vm1, %v1428_v53, 0.0  ;;  %v2177_v53 = vld [vmem:[#allocation21] ss:$0 sm:$0xff] }
 0x985   :  { %2432 = vmatpush3.bf16.msra.mxu0 %v2429_v57  ;;  %1433 = vadd.xlane.f32.xlu1 %v1432_v58  ;;  %v1429_v59 = vsel %vm531_vm1, %v1427_v54, 0.0  ;;  %v2178_v58 = vld [vmem:[#allocation22] ss:$0 sm:$0xff] }
 0x986   :  { %1430 = vadd.xlane.f32.xlu0 %v1429_v59  ;;  %2343 = vmatprep.mubr.msk.f32.mxu0 %vm1141_vm9, %v1681_v56 }
 0x987   :  { %2442 = vmatprep.subr.bf16.mxu0 %v2441_v7 }
 0x988   :  { %2344 = vmatmul.mubr.msk.f32.vlgmr.msra.gmra.mrb[10].mxu0 %vm1141_vm9, %v1682_v62 }
 0x989   :  { %2444 = vmatpush3.bf16.msra.mxu0 %v2441_v7 }
 0x98a   :  { %2446 = vmatprep.subr.bf16.mxu0 %v2445_v9 }
 0x98d   :  { %2448 = vmatpush3.bf16.msra.mxu0 %v2445_v9 }
 0xa12   :  { %v1434_v55 = vpop.xlane.xlu1 %1433 }
 0xa13   :  { %v1431_v10 = vpop.xlane.xlu0 %1430  ;;  %v1436_v11 = vadd.f32 1.0, %v1434_v55 }
 0xa14   :  { %v1435_v2 = vadd.f32 1.0, %v1431_v10 }
 0xa15   :  { %2565 = vrsqrt.f32 %v1436_v11  ;;  %vm1446_vm0 = vcmp.eq.f32.partialorder %v1436_v11, inf  ;;  %v1449_v18 = vand.u32 2147483648, %v1436_v11  ;;  %vm1448_vm15 = vcmp.eq.f32.partialorder %v1436_v11, 0.0 }
 0xa16   :  { %2567 = vrsqrt.f32 %v1435_v2  ;;  %vm1439_vm14 = vcmp.eq.f32.partialorder %v1435_v2, inf  ;;  %v1442_v20 = vand.u32 2147483648, %v1435_v2  ;;  %vm1441_vm2 = vcmp.eq.f32.partialorder %v1435_v2, 0.0 }
 0xa1f   :  { %v2566_v12 = vpop.eup %2565 }
 0xa20   :  { %v2568_v13 = vpop.eup %2567  ;;  %v1445_v14 = vmul.f32 %v2566_v12, %v1436_v11 }
 0xa21   :  { %v1438_v15 = vmul.f32 %v2568_v13, %v1435_v2 }
 0xa22   :  { %v1447_v17 = vsel %vm1446_vm0, %v1436_v11, %v1445_v14  ;;  %v2179_v11 = vld [vmem:[#allocation24] ss:$0 sm:$0xff] }
 0xa23   :  { %v1440_v21 = vsel %vm1439_vm14, %v1435_v2, %v1438_v15  ;;  %v1450_v22 = vsel %vm1448_vm15, %v1449_v18, %v1447_v17  ;;  %v2182_v15 = vld [vmem:[#allocation25] ss:$0 sm:$0xff]  ;;  %v2183_v18 = vld [vmem:[#allocation27] ss:$0 sm:$0xff] }
 0xa24   :  { %v1443_v24 = vsel %vm1441_vm2, %v1442_v20, %v1440_v21  ;;  %v1463_v25 = vmul.f32 %v2163_v23, %v1450_v22 }
 0xa25   :  { %v1462_v28 = vmul.f32 %v2163_v23, %v1443_v24 }
 0xa57   :  { %v2333_v26 = vpop.f32.mrb[8].mxu0 }
 0xa58   :  { %v1542_v29 = vadd.f32 %v2333_v26, %v1463_v25  ;;  %v1536_v30 = vpop.f32.mrb[9].mxu0 }
 0xa59   :  { %v1537_v31 = vadd.f32 %v1536_v30, %v1462_v28 }
 0xa5a   :  { %v1553_v32 = vadd.f32 %v2166_v27, %v1542_v29 }
 0xa5b   :  { %v1552_v57 = vadd.f32 %v2166_v27, %v1537_v31  ;;  %v2345_v60 = vpop.f32.mrb[10].mxu0 }
 0xa5c   :  { %v1755_v37 = vpop.f32.mrb[11].mxu0  ;;  %v1555_v38 = vmul.f32 %v1553_v32, %v1553_v32 }
 0xa5d   :  { %2354 = vmatprep.mubr.msk.f32.mxu1 %vm531_vm1, %v1755_v37  ;;  %2365 = vmatprep.mubr.msk.f32.mxu0 %vm531_vm1, %v1552_v57  ;;  %v1554_v39 = vmul.f32 %v1552_v57, %v1552_v57 }
 0xa5e   :  { %2355 = vmatmul.mubr.msk.f32.vlgmr.msra.gmra.mrb[10].mxu1 %vm531_vm1, %v2345_v60  ;;  %2366 = vmatmul.mubr.msk.f32.vlgmr.msra.gmra.mrb[12].mxu0 %vm531_vm1, %v1553_v32  ;;  %v1559_v40 = vsel %vm531_vm1, %v1555_v38, 0.0 }
 0xa5f   :  { %1560 = vadd.xlane.f32.xlu1 %v1559_v40  ;;  %v1556_v41 = vsel %vm531_vm1, %v1554_v39, 0.0  ;;  %2452 = vmatpush3.bf16.msra.mxu1 %v2449_v44 }
 0xa60   :  { %1557 = vadd.xlane.f32.xlu0 %v1556_v41  ;;  %2454 = vmatprep.subr.bf16.mxu1 %v2453_v47 }
 0xa63   :  { %2456 = vmatpush3.bf16.msra.mxu1 %v2453_v47 }
 0xaec   :  { %v1561_v7 = vpop.xlane.xlu1 %1560 }
 0xaed   :  { %v1558_v16 = vpop.xlane.xlu0 %1557  ;;  %v1563_v1 = vadd.f32 1.0, %v1561_v7 }
 0xaee   :  { %v1562_v19 = vadd.f32 1.0, %v1558_v16 }
 0xaef   :  { %2569 = vrsqrt.f32 %v1563_v1  ;;  %vm1573_vm3 = vcmp.eq.f32.partialorder %v1563_v1, inf  ;;  %v1576_v61 = vand.u32 2147483648, %v1563_v1  ;;  %vm1575_vm5 = vcmp.eq.f32.partialorder %v1563_v1, 0.0 }
 0xaf0   :  { %2571 = vrsqrt.f32 %v1562_v19  ;;  %vm1566_vm4 = vcmp.eq.f32.partialorder %v1562_v19, inf  ;;  %v1569_v55 = vand.u32 2147483648, %v1562_v19 }
 0xaf9   :  { %v2570_v33 = vpop.eup %2569 }
 0xafa   :  { %v1572_v34 = vmul.f32 %v2570_v33, %v1563_v1 }
 0xafc   :  { %v1574_v8 = vsel %vm1573_vm3, %v1563_v1, %v1572_v34 }
 0xafd   :  { %v1577_v10 = vsel %vm1575_vm5, %v1576_v61, %v1574_v8 }
 0xafe   :  { %v1890_v12 = vmul.f32 %v2179_v11, %v1577_v10 }
 0xb31   :  { %v2356_v3 = vpop.f32.mrb[10].mxu1  ;;  %v2367_v50 = vpop.f32.mrb[12].mxu0 }
 0xb32   :  { %v1853_v49 = vadd.f32 %v2356_v3, %v2174_v48  ;;  %v1847_v51 = vpop.f32.mrb[11].mxu1  ;;  %v1963_v52 = vpop.f32.mrb[13].mxu0  ;;  %v1969_v14 = vadd.f32 %v2367_v50, %v1890_v12 }
 0xb33   :  { %v1848_v54 = vadd.f32 %v2174_v48, %v1847_v51 }
 0xb34   :  { %v1857_v56 = vadd.f32 %v1853_v49, %v1680_v35  ;;  %v2572_v35 = vpop.eup %2571  ;;  %v1980_v21 = vadd.f32 %v2182_v15, %v1969_v14 }
 0xb35   :  { %v1856_v59 = vadd.f32 %v1848_v54, %v1679_v36  ;;  %v1565_v36 = vmul.f32 %v2572_v35, %v1562_v19 }
 0xb36   :  { %v1866_v62 = vmul.f32 %v2177_v53, %v1857_v56  ;;  %v2074_v26 = vmul.f32 0.5, %v1980_v21 }
 0xb37   :  { %v1865_v63 = vmul.f32 %v2177_v53, %v1856_v59  ;;  %v1567_v9 = vsel %vm1566_vm4, %v1562_v19, %v1565_v36 }
 0xb38   :  { %v1875_v0 = vadd.f32 %v2178_v58, %v1866_v62 }
 0xb39   :  { %v1874_v4 = vadd.f32 %v2178_v58, %v1865_v63 }
 0xb3a   :  { %v1877_v5 = vmax.f32 %v1875_v0, 0.0 }
 0xb3b   :  { %v1876_v6 = vmax.f32 %v1874_v4, 0.0 }
 0xb3d   :  { %2376 = vmatprep.mubr.msk.f32.mxu1 %vm531_vm1, %v1876_v6 }
 0xb3e   :  { %2377 = vmatmul.mubr.msk.f32.vlgmr.msra.gmra.mrb[12].mxu1 %vm531_vm1, %v1877_v5  ;;  %vm1568_vm1 = vcmp.eq.f32.partialorder %v1562_v19, 0.0 }
 0xb3f   :  { %v1570_v2 = vsel %vm1568_vm1, %v1569_v55, %v1567_v9 }
 0xb40   :  { %v1889_v13 = vmul.f32 %v2179_v11, %v1570_v2 }
 0xb42   :  { %v1964_v17 = vadd.f32 %v1963_v52, %v1889_v13 }
 0xb44   :  { %v1979_v20 = vadd.f32 %v2182_v15, %v1964_v17 }
 0xb46   :  { %v2073_v28 = vmul.f32 0.5, %v1979_v20 }
 0xc11   :  { %v2378_v22 = vpop.f32.mrb[12].mxu1 }
 0xc12   :  { %v2070_v23 = vadd.f32 %v2378_v22, %v2183_v18  ;;  %v2064_v24 = vpop.f32.mrb[13].mxu1 }
 0xc13   :  { %v2065_v25 = vadd.f32 %v2183_v18, %v2064_v24 }
 0xc14   :  { %v2076_v27 = vmul.f32 0.5, %v2070_v23 }
 0xc15   :  { %v2075_v29 = vmul.f32 0.5, %v2065_v25 }
 0xc16   :  { %v2078_v30 = vadd.f32 %v2076_v27, %v2074_v26 }
 0xc17   :  { %v2077_v31 = vadd.f32 %v2075_v29, %v2073_v28 }
 0xc18   :  { %2081 = vst.msk [vmem:[%s3214_s25 + $0x8] sm:$0xff] %vm2079_vm6, %v2078_v30 }
 0xc19   :  { %2080 = vst.msk [vmem:[%s3214_s25] sm:$0xff] %vm2079_vm6, %v2077_v31 }
 0xc1a   :  { %2086 = vsyncpa [#allocation3], 1 }
 0xc1b   :  { %2087 = vsyncpa [#allocation5], 1 }
 0xc1c   :  { %2088 = vsyncpa [#allocation8], 1 }
 0xc1d   :  { %2089 = vsyncpa [#allocation11], 1 }
 0xc1e   :  { %2090 = vsyncpa [#allocation14], 1 }
 0xc1f   :  { %2091 = vsyncpa [#allocation17], 1 }
 0xc20   :  { %2092 = vsyncpa [#allocation20], 1 }
 0xc21   :  { %2093 = vsyncpa [#allocation23], 1 }
 0xc22   :  { %2094 = vsyncpa [#allocation26], 1 }

</bundles_post_ra>
